<compile_context>
chip_gen: v7x
topology: tpu7x:2x2x1
jax: 0.10.0
libtpu: 0.0.40
codegen_flags: <defaults>
</compile_context>

<pallas_src>
import jax
import jax.numpy as jnp
from jax import lax
from jax.experimental import pallas as pl
from jax.experimental.pallas import tpu as pltpu


def _round_up(x: int, m: int) -> int:
    return (x + m - 1) // m * m


def _vmem_capacity_bytes() -> int:
    """Physical VMEM per core; conservative 64 MiB (v7x) fallback."""
    try:
        cap = int(pltpu.get_tpu_info().vmem_capacity_bytes)
        if cap > 0:
            return cap
    except Exception:
        pass
    return 64 * 1024 * 1024


# ---------------------------------------------------------------------------
# Kernel 1: resident-A path (A^T fits in VMEM).  No grid -> no pipelining ->
# every operand is single-buffered; the layer loop is a small static unroll.
# ---------------------------------------------------------------------------
def _make_resident_kernel(n_layers: int):
    inv = 1.0 / float(n_layers + 1)

    def kernel(adj_t_ref, emb_t_ref, out_ref, e_scr):
        e0 = emb_t_ref[...]                         # f32 (D, N_pad), lane-dense
        e_scr[...] = e0.astype(e_scr.dtype)         # bf16 copy fed to the MXU
        out_ref[...] = e0                           # f32 layer-mean accumulator
        for _ in range(n_layers):                   # small, statically unrolled
            new_e = jnp.dot(e_scr[...], adj_t_ref[...],
                            preferred_element_type=jnp.float32)
            e_scr[...] = new_e.astype(e_scr.dtype)
            out_ref[...] += new_e
        out_ref[...] = out_ref[...] * inv

    return kernel


# ---------------------------------------------------------------------------
# Kernel 2: streaming path.  grid = (n_layers, n_blk, n_blk); A^T streamed as
# (tile, tile) bf16 blocks; E^T ping-pong scratch blocked as (2*n_blk, D, tile)
# so all dynamic indexing is on the leading dim; layer mean goes straight into
# the resident blocked output.
# ---------------------------------------------------------------------------
def _make_streaming_kernel(n_layers: int, n_blocks: int):
    inv = 1.0 / float(n_layers + 1)

    def kernel(adj_t_ref, emb_ref, out_ref, e_scr, tile_acc):
        l = pl.program_id(0)           # layer (outermost, sequential dependence)
        j = pl.program_id(1)           # output column tile of E^T
        k = pl.program_id(2)           # reduction tile (innermost)
        n_j = pl.num_programs(1)
        n_k = pl.num_programs(2)

        # One-time init: E_0^T -> ping-pong slot 0, output accumulator = E_0^T.
        @pl.when((l == 0) & (j == 0) & (k == 0))
        def _init():
            def body(b, carry):
                e0b = emb_ref[b]                      # f32 (D, tile)
                e_scr[b] = e0b.astype(e_scr.dtype)
                out_ref[b] = e0b
                return carry
            lax.fori_loop(0, n_blocks, body, 0)

        @pl.when(k == 0)
        def _zero_tile_acc():
            tile_acc[...] = jnp.zeros_like(tile_acc)

        slot = l % 2
        e_blk = e_scr[slot * n_blocks + k]            # bf16 (D, tile)
        tile_acc[...] += jnp.dot(e_blk, adj_t_ref[...],
                                 preferred_element_type=jnp.float32)

        @pl.when(k == n_k - 1)
        def _col_tile_done():
            new_cols = tile_acc[...]                  # f32 (D, tile)
            e_scr[(1 - slot) * n_blocks + j] = new_cols.astype(e_scr.dtype)
            out_ref[j] += new_cols

        @pl.when((l == n_layers - 1) & (j == n_j - 1) & (k == n_k - 1))
        def _finalize():
            def body(b, carry):
                out_ref[b] = out_ref[b] * inv
                return carry
            lax.fori_loop(0, n_blocks, body, 0)

    return kernel


def lightgcn_forward(adj_matrix, user_emb, item_emb, n_layers,
                     *, tile=None, force_stream=False):
    """Pallas-backed LightGCN forward.

    adj_matrix : (N, N) f32 dense normalized adjacency, N = n_users + n_items
    user_emb   : (n_users, D) f32
    item_emb   : (n_items, D) f32
    returns    : (user_out (n_users, D), item_out (n_items, D))
    """
    n_users, d = user_emb.shape
    n_items, _ = item_emb.shape
    n = n_users + n_items
    assert adj_matrix.shape == (n, n)

    all_emb = jnp.concatenate([user_emb, item_emb], axis=0).astype(jnp.float32)
    if n_layers == 0:
        return all_emb[:n_users], all_emb[n_users:]

    d_pad = _round_up(d, 16)                # sublane axis (f32 needs 8, bf16 16)
    cap = _vmem_capacity_bytes()
    budget = int(cap * 0.78)                # leave headroom for compiler scratch
    vmem_limit = int(cap * 0.85)
    fudge = 4 * 1024 * 1024                 # internal temps (full-width dot result)

    # Transposed, lane-dense layout: E^T (D, N); E_{l+1}^T = E_l^T @ A^T.
    emb_t = all_emb.T                                        # (d, n) f32
    adj_t = adj_matrix.astype(jnp.float32).T                 # exact for any A

    # --------------------------- resident path -----------------------------
    n_res = _round_up(n, 128)
    resident_bytes = (n_res * n_res * 2                      # A^T bf16, 1 buffer
                      + d_pad * n_res * (4 + 4 + 2)          # emb_t, out, e_scr
                      + fudge)
    if resident_bytes <= budget and not force_stream:
        adj_t_p = jnp.pad(adj_t, ((0, n_res - n), (0, n_res - n))).astype(jnp.bfloat16)
        emb_t_p = jnp.pad(emb_t, ((0, d_pad - d), (0, n_res - n)))
        out_t = pl.pallas_call(
            _make_resident_kernel(n_layers),
            out_shape=jax.ShapeDtypeStruct((d_pad, n_res), jnp.float32),
            scratch_shapes=[pltpu.VMEM((d_pad, n_res), jnp.bfloat16)],  # E_l^T
            compiler_params=pltpu.CompilerParams(vmem_limit_bytes=vmem_limit),
        )(adj_t_p, emb_t_p)
        out = out_t[:d, :n].T
        return out[:n_users], out[n_users:]

    # --------------------------- streaming path ----------------------------
    if tile is None:
        candidates = [2048, 1024, 512, 256, 128]
    else:
        t_req = max(128, _round_up(int(tile), 128))
        candidates = [t_req, 2048, 1024, 512, 256, 128]

    chosen = None
    for t in candidates:
        t = min(t, _round_up(n, 128))
        n_pad = _round_up(n, t)
        n_blk = n_pad // t
        # emb/out f32 (x2 pipeline buffers each) + ping-pong bf16 E_l^T scratch.
        e_side = d_pad * n_pad * (2 * 4 + 2 * 4 + 2 * 2)
        a_side = 2 * t * t * 2 + d_pad * t * 4               # A^T tiles + tile_acc
        if e_side + a_side + fudge <= budget:
            chosen = (t, n_pad, n_blk)
            break
    if chosen is None:
        raise ValueError(
            "LightGCN graph too large for VMEM-resident embeddings in the "
            "streaming kernel on this TPU generation.")
    t, n_pad, n_blk = chosen

    adj_t_p = jnp.pad(adj_t, ((0, n_pad - n), (0, n_pad - n))).astype(jnp.bfloat16)
    emb_t_p = jnp.pad(emb_t, ((0, d_pad - d), (0, n_pad - n)))
    emb_blk = emb_t_p.reshape(d_pad, n_blk, t).transpose(1, 0, 2)    # (n_blk, d, t)

    out_blk = pl.pallas_call(
        _make_streaming_kernel(n_layers, n_blk),
        out_shape=jax.ShapeDtypeStruct((n_blk, d_pad, t), jnp.float32),
        grid=(n_layers, n_blk, n_blk),
        in_specs=[
            pl.BlockSpec((t, t), lambda l, j, k: (k, j)),              # stream A^T
            pl.BlockSpec((n_blk, d_pad, t), lambda l, j, k: (0, 0, 0)),  # E_0^T blocks
        ],
        out_specs=pl.BlockSpec((n_blk, d_pad, t), lambda l, j, k: (0, 0, 0)),
        scratch_shapes=[
            pltpu.VMEM((2 * n_blk, d_pad, t), jnp.bfloat16),  # ping-pong E_l^T
            pltpu.VMEM((d_pad, t), jnp.float32),              # per-col-tile K partials
        ],
        compiler_params=pltpu.CompilerParams(
            dimension_semantics=("arbitrary", "arbitrary", "arbitrary"),
            vmem_limit_bytes=vmem_limit,
        ),
    )(adj_t_p, emb_blk)

    out = out_blk.transpose(0, 2, 1).reshape(n_pad, d_pad)[:n, :d]
    return out[:n_users], out[n_users:]


def build_normalized_adj(interactions, n_users, n_items):
    """Symmetric-normalized bipartite adjacency D^{-1/2} A D^{-1/2} (dense f32)."""
    n = n_users + n_items
    a = jnp.zeros((n, n), dtype=jnp.float32)
    a = a.at[:n_users, n_users:].set(interactions)
    a = a.at[n_users:, :n_users].set(interactions.T)
    deg = jnp.sum(a, axis=1)
    d_inv_sqrt = jnp.where(deg > 0, 1.0 / jnp.sqrt(jnp.maximum(deg, 1e-12)), 0.0)
    return a * d_inv_sqrt[:, None] * d_inv_sqrt[None, :]


def lightgcn_reference(adj, user_emb, item_emb, n_layers):
    """Plain-JAX f32 reference with the same semantics as the torch forward."""
    e = jnp.concatenate([user_emb, item_emb], axis=0)
    acc = e
    cur = e
    for _ in range(n_layers):
        cur = adj @ cur
        acc = acc + cur
    out = acc / float(n_layers + 1)
    return out[:user_emb.shape[0]], out[user_emb.shape[0]:]


if __name__ == "__main__":
    # Small deterministic config (N = 480 is NOT a tile multiple -> exercises padding).
    n_users = 190
    n_items = 290
    n_layers = 3
    embedding_dim = 32

    key = jax.random.PRNGKey(0)
    k_user, k_item, k_adj = jax.random.split(key, 3)

    # nn.init.normal_(std=0.1) equivalents.
    user_emb = 0.1 * jax.random.normal(k_user, (n_users, embedding_dim), dtype=jnp.float32)
    item_emb = 0.1 * jax.random.normal(k_item, (n_items, embedding_dim), dtype=jnp.float32)

    # Deterministic synthetic user-item interactions -> normalized adjacency.
    interactions = (jax.random.uniform(k_adj, (n_users, n_items)) < 0.08).astype(jnp.float32)
    adj = build_normalized_adj(interactions, n_users, n_items)

    # Path 1: resident-A kernel (A fits in VMEM at this size).
    u_res, i_res = lightgcn_forward(adj, user_emb, item_emb, n_layers)
    # Path 2: tiled streaming kernel (forced, 128-tiles -> grid (3, 4, 4)).
    u_str, i_str = lightgcn_forward(adj, user_emb, item_emb, n_layers,
                                    tile=128, force_stream=True)
    jax.block_until_ready((u_res, i_res, u_str, i_str))

    ref_u, ref_i = lightgcn_reference(adj, user_emb, item_emb, n_layers)

    for (uo, io), name in [((u_res, i_res), "resident"), ((u_str, i_str), "streaming")]:
        assert uo.shape == (n_users, embedding_dim), name
        assert io.shape == (n_items, embedding_dim), name
        # bf16 adjacency / bf16 E_l rounding -> loose-but-meaningful tolerances.
        assert jnp.allclose(uo, ref_u, atol=5e-3, rtol=3e-2), name
        assert jnp.allclose(io, ref_i, atol=5e-3, rtol=3e-2), name

    print("KERNEL_OK")
</pallas_src>

<mosaic_0001>
module attributes {stable_mosaic.version = 11 : i64} {
  func.func @kernel(%arg0: memref<512x512xbf16, #tpu.memory_space<vmem>>, %arg1: memref<32x512xf32, #tpu.memory_space<vmem>>, %arg2: memref<32x512xf32, #tpu.memory_space<vmem>>, %arg3: memref<32x512xbf16, #tpu.memory_space<vmem>>) attributes {dimension_semantics = [], scalar_prefetch = 0 : i64, scratch_operands = 1 : i64, tpu.core_type = #tpu.core_type<tc>} {
    %c0 = arith.constant 0 : index
    %c0_0 = arith.constant 0 : index
    %0 = vector.load %arg1[%c0, %c0_0] : memref<32x512xf32, #tpu.memory_space<vmem>>, vector<32x512xf32>
    %1 = arith.truncf %0 : vector<32x512xf32> to vector<32x512xbf16>
    %c0_1 = arith.constant 0 : index
    %c0_2 = arith.constant 0 : index
    %2 = vector.load %arg3[%c0_1, %c0_2] : memref<32x512xbf16, #tpu.memory_space<vmem>>, vector<32x512xbf16>
    tpu.vector_store %arg3[%c0_1, %c0_2], %1 {strides = array<i32>} : memref<32x512xbf16, #tpu.memory_space<vmem>>, vector<32x512xbf16>,
    %c0_3 = arith.constant 0 : index
    %c0_4 = arith.constant 0 : index
    %3 = vector.load %arg2[%c0_3, %c0_4] : memref<32x512xf32, #tpu.memory_space<vmem>>, vector<32x512xf32>
    tpu.vector_store %arg2[%c0_3, %c0_4], %0 {strides = array<i32>} : memref<32x512xf32, #tpu.memory_space<vmem>>, vector<32x512xf32>,
    %c0_5 = arith.constant 0 : index
    %c0_6 = arith.constant 0 : index
    %4 = vector.load %arg3[%c0_5, %c0_6] : memref<32x512xbf16, #tpu.memory_space<vmem>>, vector<32x512xbf16>
    %c0_7 = arith.constant 0 : index
    %c0_8 = arith.constant 0 : index
    %5 = vector.load %arg0[%c0_7, %c0_8] : memref<512x512xbf16, #tpu.memory_space<vmem>>, vector<512x512xbf16>
    %cst = arith.constant dense<0.000000e+00> : vector<32x512xf32>
    %6 = tpu.matmul %4, %5, %cst {dimension_numbers = #tpu.dot_dimension_numbers<[1], [0], [0], [1], [0, 0, 1, 1], [], []>} : vector<32x512xbf16>, vector<512x512xbf16>, vector<32x512xf32> -> vector<32x512xf32>
    %7 = arith.truncf %6 : vector<32x512xf32> to vector<32x512xbf16>
    %c0_9 = arith.constant 0 : index
    %c0_10 = arith.constant 0 : index
    %8 = vector.load %arg3[%c0_9, %c0_10] : memref<32x512xbf16, #tpu.memory_space<vmem>>, vector<32x512xbf16>
    tpu.vector_store %arg3[%c0_9, %c0_10], %7 {strides = array<i32>} : memref<32x512xbf16, #tpu.memory_space<vmem>>, vector<32x512xbf16>,
    %c0_11 = arith.constant 0 : index
    %c0_12 = arith.constant 0 : index
    %9 = vector.load %arg2[%c0_11, %c0_12] : memref<32x512xf32, #tpu.memory_space<vmem>>, vector<32x512xf32>
    %10 = arith.addf %9, %6 : vector<32x512xf32>
    %c0_13 = arith.constant 0 : index
    %c0_14 = arith.constant 0 : index
    %11 = vector.load %arg2[%c0_13, %c0_14] : memref<32x512xf32, #tpu.memory_space<vmem>>, vector<32x512xf32>
    tpu.vector_store %arg2[%c0_13, %c0_14], %10 {strides = array<i32>} : memref<32x512xf32, #tpu.memory_space<vmem>>, vector<32x512xf32>,
    %c0_15 = arith.constant 0 : index
    %c0_16 = arith.constant 0 : index
    %12 = vector.load %arg3[%c0_15, %c0_16] : memref<32x512xbf16, #tpu.memory_space<vmem>>, vector<32x512xbf16>
    %c0_17 = arith.constant 0 : index
    %c0_18 = arith.constant 0 : index
    %13 = vector.load %arg0[%c0_17, %c0_18] : memref<512x512xbf16, #tpu.memory_space<vmem>>, vector<512x512xbf16>
    %cst_19 = arith.constant dense<0.000000e+00> : vector<32x512xf32>
    %14 = tpu.matmul %12, %13, %cst_19 {dimension_numbers = #tpu.dot_dimension_numbers<[1], [0], [0], [1], [0, 0, 1, 1], [], []>} : vector<32x512xbf16>, vector<512x512xbf16>, vector<32x512xf32> -> vector<32x512xf32>
    %15 = arith.truncf %14 : vector<32x512xf32> to vector<32x512xbf16>
    %c0_20 = arith.constant 0 : index
    %c0_21 = arith.constant 0 : index
    %16 = vector.load %arg3[%c0_20, %c0_21] : memref<32x512xbf16, #tpu.memory_space<vmem>>, vector<32x512xbf16>
    tpu.vector_store %arg3[%c0_20, %c0_21], %15 {strides = array<i32>} : memref<32x512xbf16, #tpu.memory_space<vmem>>, vector<32x512xbf16>,
    %c0_22 = arith.constant 0 : index
    %c0_23 = arith.constant 0 : index
    %17 = vector.load %arg2[%c0_22, %c0_23] : memref<32x512xf32, #tpu.memory_space<vmem>>, vector<32x512xf32>
    %18 = arith.addf %17, %14 : vector<32x512xf32>
    %c0_24 = arith.constant 0 : index
    %c0_25 = arith.constant 0 : index
    %19 = vector.load %arg2[%c0_24, %c0_25] : memref<32x512xf32, #tpu.memory_space<vmem>>, vector<32x512xf32>
    tpu.vector_store %arg2[%c0_24, %c0_25], %18 {strides = array<i32>} : memref<32x512xf32, #tpu.memory_space<vmem>>, vector<32x512xf32>,
    %c0_26 = arith.constant 0 : index
    %c0_27 = arith.constant 0 : index
    %20 = vector.load %arg3[%c0_26, %c0_27] : memref<32x512xbf16, #tpu.memory_space<vmem>>, vector<32x512xbf16>
    %c0_28 = arith.constant 0 : index
    %c0_29 = arith.constant 0 : index
    %21 = vector.load %arg0[%c0_28, %c0_29] : memref<512x512xbf16, #tpu.memory_space<vmem>>, vector<512x512xbf16>
    %cst_30 = arith.constant dense<0.000000e+00> : vector<32x512xf32>
    %22 = tpu.matmul %20, %21, %cst_30 {dimension_numbers = #tpu.dot_dimension_numbers<[1], [0], [0], [1], [0, 0, 1, 1], [], []>} : vector<32x512xbf16>, vector<512x512xbf16>, vector<32x512xf32> -> vector<32x512xf32>
    %23 = arith.truncf %22 : vector<32x512xf32> to vector<32x512xbf16>
    %c0_31 = arith.constant 0 : index
    %c0_32 = arith.constant 0 : index
    %24 = vector.load %arg3[%c0_31, %c0_32] : memref<32x512xbf16, #tpu.memory_space<vmem>>, vector<32x512xbf16>
    tpu.vector_store %arg3[%c0_31, %c0_32], %23 {strides = array<i32>} : memref<32x512xbf16, #tpu.memory_space<vmem>>, vector<32x512xbf16>,
    %c0_33 = arith.constant 0 : index
    %c0_34 = arith.constant 0 : index
    %25 = vector.load %arg2[%c0_33, %c0_34] : memref<32x512xf32, #tpu.memory_space<vmem>>, vector<32x512xf32>
    %26 = arith.addf %25, %22 : vector<32x512xf32>
    %c0_35 = arith.constant 0 : index
    %c0_36 = arith.constant 0 : index
    %27 = vector.load %arg2[%c0_35, %c0_36] : memref<32x512xf32, #tpu.memory_space<vmem>>, vector<32x512xf32>
    tpu.vector_store %arg2[%c0_35, %c0_36], %26 {strides = array<i32>} : memref<32x512xf32, #tpu.memory_space<vmem>>, vector<32x512xf32>,
    %c0_37 = arith.constant 0 : index
    %c0_38 = arith.constant 0 : index
    %28 = vector.load %arg2[%c0_37, %c0_38] : memref<32x512xf32, #tpu.memory_space<vmem>>, vector<32x512xf32>
    %cst_39 = arith.constant 2.500000e-01 : f32
    %29 = vector.broadcast %cst_39 : f32 to vector<32x512xf32>
    %30 = arith.mulf %28, %29 : vector<32x512xf32>
    %c0_40 = arith.constant 0 : index
    %c0_41 = arith.constant 0 : index
    %31 = vector.load %arg2[%c0_40, %c0_41] : memref<32x512xf32, #tpu.memory_space<vmem>>, vector<32x512xf32>
    tpu.vector_store %arg2[%c0_40, %c0_41], %30 {strides = array<i32>} : memref<32x512xf32, #tpu.memory_space<vmem>>, vector<32x512xf32>,
    return
  }
}

</mosaic_0001>

<bundles_post_ra>
// kernel: tpu_custom_call.1
= control target key start
LH: loop header
LB: loop body
LE: loop exit
PB: predicated region body
PF: predicated region fallthrough
CT: control target
= control target key end

     0   :  { %7 = vsyncpa [#allocation4], 0  ;;  %s4892_s0 = inlined_call_operand.hbm [shape: bf16[512,512], index: 0, kind: input, shape index: {}]   ;;  %s4893_s1 = inlined_call_operand.hbm [shape: f32[32,512], index: 1, kind: input, shape index: {}]   ;;  %s4894_s2 = inlined_call_operand.hbm [shape: f32[32,512], index: 2, kind: output, shape index: {}]  }
   0x1   :  { %8 = vsyncpa [#allocation7], 0 }
   0x2   :  { %9 = vsyncpa [#allocation5], 0  ;;  %s4236_s9 = smov [#allocation3]   ;;  %s4164_s13 = scalar_lea.hbm %s4892_s0, 16384 }
   0x3   :  { %s15_s10 = sshll.u32 %s4236_s9, 4  ;;  %p4165_p0 = scmp.ne.s32.totalorder %s4892_s0, %s4164_s13  ;;  %s16_s10 = int_to_ptr.vmem [resolvable:$true] %s15_s10 }
   0x4   :  { %p4168_p1 = scmp.lt.u32.totalorder %s4164_s13, %s4892_s0 }
   0x6   :  { %p4170_p2 = pnand %p4168_p1, %p4165_p0 }
   0x8   :  { %4173 = shalt.err (!%p4170_p2)
}
   0x9   :  { %s4174_s18 = scalar_lea.vmem %s16_s10, 16384  ;;  %p4179_p4 = scmp.lt.s32.totalorder %s16_s10, %s16_s10 }
   0xa   :  { %p4175_p3 = scmp.ne.s32.totalorder %s16_s10, %s4174_s18  ;;  %p4180_p5 = scmp.lt.s32.totalorder %s4174_s18, %s4174_s18 }
   0xc   :  { %p4181_p6 = por %p4180_p5, %p4179_p4 }
   0xe   :  { %p4182_p7 = pnand %p4181_p6, %p4175_p3 }
  0x10   :  { %4185 = shalt.err (!%p4182_p7)
}
  0x11   :  { %s4237_s19 = smov 256   ;;  %s4238_s20 = smov 16  }
  0x12   :  { %21 = dma.hbm_to_vmem [thread:$0]  %s4892_s0, 16384, %s16_s10, [#allocation4], %s4237_s19, %s4237_s19, %s4238_s20  }
  0x13   :  { %s4239_s23 = smov [#allocation6]   ;;  %s4186_s27 = scalar_lea.hbm %s4893_s1, 2048 }
  0x14   :  { %s27_s24 = sshll.u32 %s4239_s23, 4  ;;  %p4187_p8 = scmp.ne.s32.totalorder %s4893_s1, %s4186_s27  ;;  %s28_s24 = int_to_ptr.vmem [resolvable:$true] %s27_s24 }
  0x15   :  { %p4190_p9 = scmp.lt.u32.totalorder %s4186_s27, %s4893_s1 }
  0x17   :  { %p4192_p10 = pnand %p4190_p9, %p4187_p8 }
  0x19   :  { %4195 = shalt.err (!%p4192_p10)
}
  0x1a   :  { %s4196_s4 = scalar_lea.vmem %s28_s24, 2048  ;;  %p4201_p12 = scmp.lt.s32.totalorder %s28_s24, %s28_s24 }
  0x1b   :  { %p4197_p11 = scmp.ne.s32.totalorder %s28_s24, %s4196_s4  ;;  %p4202_p13 = scmp.lt.s32.totalorder %s4196_s4, %s4196_s4 }
  0x1d   :  { %p4203_p0 = por %p4202_p13, %p4201_p12 }
  0x1f   :  { %p4204_p1 = pnand %p4203_p0, %p4197_p11 }
  0x21   :  { %4207 = shalt.err (!%p4204_p1)
}
  0x22   :  { %s4240_s0 = smov 512   ;;  %s4241_s5 = smov 32  }
  0x23   :  { %33 = dma.hbm_to_vmem [thread:$0]  %s4893_s1, 2048, %s28_s24, [#allocation7], %s4240_s0, %s4240_s0, %s4241_s5  }
  0x24   :  { %4230 = dma.done.wait [#allocation4], 16384  }
  0x25   :  { %4231 = vsyncadd [#allocation4], 4294950912 }
  0x26   :  { %4232 = dma.done.wait [#allocation7], 2048  }
  0x27   :  { %4233 = vsyncadd [#allocation7], 4294965248  ;;  %v3749_v0 = vld [vmem:[#allocation3 + $0x4] ss:$16 sps:$4 sm:$0xff]   ;;  %v3751_v1 = vld [vmem:[#allocation3 + $0xc] ss:$16 sps:$4 sm:$0xff]  }
  0x28   :  { %864 = vmatprep.subr.bf16.mxu0 %v3749_v0  ;;  %v3753_v2 = vld [vmem:[#allocation3] ss:$16 sps:$4 sm:$0xff]   ;;  %v3754_v3 = vld [vmem:[#allocation3 + $0x8] ss:$16 sps:$4 sm:$0xff]   ;;  %970 = vmatprep.subr.bf16.mxu1 %v3751_v1  ;;  %v3755_v4 = vld [vmem:[#allocation3 + $0x24] ss:$16 sps:$4 sm:$0xff]  }
  0x29   :  { %865 = vmatpush1.bf16.msra.mxu0 %v3753_v2  ;;  %971 = vmatpush1.bf16.msra.mxu1 %v3754_v3  ;;  %v3757_v5 = vld [vmem:[#allocation3 + $0x2c] ss:$16 sps:$4 sm:$0xff]   ;;  %v3759_v6 = vld [vmem:[#allocation3 + $0x20] ss:$16 sps:$4 sm:$0xff]   ;;  %v3760_v7 = vld [vmem:[#allocation3 + $0x28] ss:$16 sps:$4 sm:$0xff]  }
  0x2a   :  { %866 = vmatprep.subr.bf16.mxu0 %v3755_v4  ;;  %972 = vmatprep.subr.bf16.mxu1 %v3757_v5  ;;  %v3761_v8 = vld [vmem:[#allocation3 + $0x44] ss:$16 sps:$4 sm:$0xff]   ;;  %v3763_v9 = vld [vmem:[#allocation3 + $0x4c] ss:$16 sps:$4 sm:$0xff]   ;;  %v3765_v10 = vld [vmem:[#allocation3 + $0x40] ss:$16 sps:$4 sm:$0xff]  }
  0x2b   :  { %v3766_v11 = vld [vmem:[#allocation3 + $0x48] ss:$16 sps:$4 sm:$0xff]   ;;  %v3767_v12 = vld [vmem:[#allocation3 + $0x64] ss:$16 sps:$4 sm:$0xff]   ;;  %v3769_v13 = vld [vmem:[#allocation3 + $0x6c] ss:$16 sps:$4 sm:$0xff]  }
  0x2c   :  { %v3771_v14 = vld [vmem:[#allocation3 + $0x60] ss:$16 sps:$4 sm:$0xff]   ;;  %v3772_v15 = vld [vmem:[#allocation3 + $0x68] ss:$16 sps:$4 sm:$0xff]   ;;  %v3773_v16 = vld [vmem:[#allocation3 + $0x84] ss:$16 sps:$4 sm:$0xff]  }
  0x2d   :  { %867 = vmatpush1.bf16.msra.mxu0 %v3759_v6  ;;  %973 = vmatpush1.bf16.msra.mxu1 %v3760_v7  ;;  %v3775_v17 = vld [vmem:[#allocation3 + $0x8c] ss:$16 sps:$4 sm:$0xff]   ;;  %v3777_v18 = vld [vmem:[#allocation3 + $0x80] ss:$16 sps:$4 sm:$0xff]   ;;  %v3778_v19 = vld [vmem:[#allocation3 + $0x88] ss:$16 sps:$4 sm:$0xff]  }
  0x2e   :  { %868 = vmatprep.subr.bf16.mxu0 %v3761_v8  ;;  %974 = vmatprep.subr.bf16.mxu1 %v3763_v9  ;;  %v3779_v20 = vld [vmem:[#allocation3 + $0xa4] ss:$16 sps:$4 sm:$0xff]   ;;  %v4285_v21 = vld [vmem:[#allocation3 + $0xac] ss:$16 sps:$4 sm:$0xff]   ;;  %v4287_v22 = vld [vmem:[#allocation3 + $0xa0] ss:$16 sps:$4 sm:$0xff]  }
  0x2f   :  { %v4289_v23 = vld [vmem:[#allocation3 + $0xa8] ss:$16 sps:$4 sm:$0xff]   ;;  %v4291_v24 = vld [vmem:[#allocation3 + $0xc4] ss:$16 sps:$4 sm:$0xff]   ;;  %v4294_v25 = vld [vmem:[#allocation3 + $0xcc] ss:$16 sps:$4 sm:$0xff]  }
  0x30   :  { %v4296_v26 = vld [vmem:[#allocation3 + $0xc0] ss:$16 sps:$4 sm:$0xff]   ;;  %v4298_v27 = vld [vmem:[#allocation3 + $0xc8] ss:$16 sps:$4 sm:$0xff]   ;;  %v4302_v28 = vld [vmem:[#allocation3 + $0xe4] ss:$16 sps:$4 sm:$0xff]  }
  0x31   :  { %869 = vmatpush1.bf16.msra.mxu0 %v3765_v10  ;;  %975 = vmatpush1.bf16.msra.mxu1 %v3766_v11  ;;  %v4306_v29 = vld [vmem:[#allocation3 + $0xec] ss:$16 sps:$4 sm:$0xff]   ;;  %v4308_v30 = vld [vmem:[#allocation3 + $0xe0] ss:$16 sps:$4 sm:$0xff]   ;;  %v4312_v31 = vld [vmem:[#allocation3 + $0xe8] ss:$16 sps:$4 sm:$0xff]  }
  0x32   :  { %870 = vmatprep.subr.bf16.mxu0 %v3767_v12  ;;  %976 = vmatprep.subr.bf16.mxu1 %v3769_v13  ;;  %v4314_v32 = vld [vmem:[#allocation3 + $0x104] ss:$16 sps:$4 sm:$0xff]   ;;  %v4318_v33 = vld [vmem:[#allocation3 + $0x10c] ss:$16 sps:$4 sm:$0xff]   ;;  %v4320_v34 = vld [vmem:[#allocation3 + $0x100] ss:$16 sps:$4 sm:$0xff]  }
  0x33   :  { %v4322_v35 = vld [vmem:[#allocation3 + $0x108] ss:$16 sps:$4 sm:$0xff]   ;;  %v4326_v36 = vld [vmem:[#allocation3 + $0x124] ss:$16 sps:$4 sm:$0xff]   ;;  %v4330_v37 = vld [vmem:[#allocation3 + $0x12c] ss:$16 sps:$4 sm:$0xff]  }
  0x34   :  { %v4332_v38 = vld [vmem:[#allocation3 + $0x120] ss:$16 sps:$4 sm:$0xff]   ;;  %v4336_v39 = vld [vmem:[#allocation3 + $0x128] ss:$16 sps:$4 sm:$0xff]   ;;  %v4338_v40 = vld [vmem:[#allocation3 + $0x144] ss:$16 sps:$4 sm:$0xff]  }
  0x35   :  { %871 = vmatpush1.bf16.msra.mxu0 %v3771_v14  ;;  %977 = vmatpush1.bf16.msra.mxu1 %v3772_v15  ;;  %v4342_v41 = vld [vmem:[#allocation3 + $0x14c] ss:$16 sps:$4 sm:$0xff]   ;;  %v4344_v42 = vld [vmem:[#allocation3 + $0x140] ss:$16 sps:$4 sm:$0xff]   ;;  %v4346_v43 = vld [vmem:[#allocation3 + $0x148] ss:$16 sps:$4 sm:$0xff]  }
  0x36   :  { %872 = vmatprep.subr.bf16.mxu0 %v3773_v16  ;;  %978 = vmatprep.subr.bf16.mxu1 %v3775_v17  ;;  %v4350_v44 = vld [vmem:[#allocation3 + $0x164] ss:$16 sps:$4 sm:$0xff]   ;;  %v4354_v45 = vld [vmem:[#allocation3 + $0x16c] ss:$16 sps:$4 sm:$0xff]   ;;  %v4358_v48 = vld [vmem:[#allocation3 + $0x160] ss:$16 sps:$4 sm:$0xff]  }
  0x37   :  { %v41_v46 = vld [vmem:[#allocation6 + $0x8] sm:$0xff]  ;;  %v4364_v51 = vld [vmem:[#allocation3 + $0x184] ss:$16 sps:$4 sm:$0xff]   ;;  %v4368_v53 = vld [vmem:[#allocation3 + $0x180] ss:$16 sps:$4 sm:$0xff]   ;;  %s4242_s1 = smov [#allocation8]  }
  0x38   :  { %v45_v47 = vld [vmem:[#allocation6 + $0x28] sm:$0xff]  ;;  %v4374_v55 = vld [vmem:[#allocation3 + $0x1a4] ss:$16 sps:$4 sm:$0xff]   ;;  %v4380_v57 = vld [vmem:[#allocation3 + $0x1a0] ss:$16 sps:$4 sm:$0xff]   ;;  %s3297_s8 = sshll.u32 %s4242_s1, 4  ;;  %s3298_s8 = int_to_ptr.vmem [resolvable:$true] %s3297_s8 }
  0x39   :  { %873 = vmatpush1.bf16.msra.mxu0 %v3777_v18  ;;  %979 = vmatpush1.bf16.msra.mxu1 %v3778_v19  ;;  %v4360_v49 = vld [vmem:[#allocation3 + $0x168] ss:$16 sps:$4 sm:$0xff]   ;;  %v57_v50 = vpack.c.bf16 %v45_v47, %v41_v46  ;;  %v4366_v52 = vld [vmem:[#allocation3 + $0x18c] ss:$16 sps:$4 sm:$0xff]   ;;  %v4386_v59 = vld [vmem:[#allocation3 + $0x1c4] ss:$16 sps:$4 sm:$0xff]   ;;  %p4213_p3 = scmp.lt.s32.totalorder %s3298_s8, %s3298_s8 }
  0x3a   :  { %874 = vmatprep.subr.bf16.mxu0 %v3779_v20  ;;  %980 = vmatprep.subr.bf16.mxu1 %v4285_v21  ;;  %v4370_v54 = vld [vmem:[#allocation3 + $0x188] ss:$16 sps:$4 sm:$0xff]   ;;  %v4378_v56 = vld [vmem:[#allocation3 + $0x1ac] ss:$16 sps:$4 sm:$0xff]   ;;  %v4392_v61 = vld [vmem:[#allocation3 + $0x1c0] ss:$16 sps:$4 sm:$0xff]  }
  0x3b   :  { %896 = vmatprep.mubr.bf16.mxu0 %v57_v50  ;;  %1002 = vmatprep.mubr.bf16.mxu1 %v57_v50  ;;  %v4382_v58 = vld [vmem:[#allocation3 + $0x1a8] ss:$16 sps:$4 sm:$0xff]   ;;  %v4390_v60 = vld [vmem:[#allocation3 + $0x1cc] ss:$16 sps:$4 sm:$0xff]   ;;  %v4398_v63 = vld [vmem:[#allocation3 + $0x1e4] ss:$16 sps:$4 sm:$0xff]  }
  0x3c   :  { %v4394_v62 = vld [vmem:[#allocation3 + $0x1c8] ss:$16 sps:$4 sm:$0xff]   ;;  %v4402_v0 = vld [vmem:[#allocation3 + $0x1ec] ss:$16 sps:$4 sm:$0xff]   ;;  %v4404_v1 = vld [vmem:[#allocation3 + $0x1e0] ss:$16 sps:$4 sm:$0xff]  }
  0x3d   :  { %875 = vmatpush1.bf16.msra.mxu0 %v4287_v22  ;;  %981 = vmatpush1.bf16.msra.mxu1 %v4289_v23  ;;  %v4406_v2 = vld [vmem:[#allocation3 + $0x1e8] ss:$16 sps:$4 sm:$0xff]   ;;  %v4408_v3 = vld [vmem:[#allocation3 + $0x204] ss:$16 sps:$4 sm:$0xff]   ;;  %v4414_v6 = vld [vmem:[#allocation3 + $0x20c] ss:$16 sps:$4 sm:$0xff]  }
  0x3e   :  { %876 = vmatprep.subr.bf16.mxu0 %v4291_v24  ;;  %982 = vmatprep.subr.bf16.mxu1 %v4294_v25  ;;  %v40_v4 = vld [vmem:[#allocation6] sm:$0xff]  ;;  %v4418_v8 = vld [vmem:[#allocation3 + $0x208] ss:$16 sps:$4 sm:$0xff]   ;;  %v4426_v11 = vld [vmem:[#allocation3 + $0x22c] ss:$16 sps:$4 sm:$0xff]   ;;  %s4208_s9 = scalar_lea.vmem %s3298_s8, 2048 }
  0x3f   :  { %v44_v5 = vld [vmem:[#allocation6 + $0x20] sm:$0xff]  ;;  %v4430_v13 = vld [vmem:[#allocation3 + $0x228] ss:$16 sps:$4 sm:$0xff]   ;;  %v4438_v15 = vld [vmem:[#allocation3 + $0x24c] ss:$16 sps:$4 sm:$0xff]   ;;  %p4209_p2 = scmp.ne.s32.totalorder %s3298_s8, %s4208_s9  ;;  %p4214_p4 = scmp.lt.s32.totalorder %s4208_s9, %s4208_s9 }
  0x40   :  { %v4416_v7 = vld [vmem:[#allocation3 + $0x200] ss:$16 sps:$4 sm:$0xff]   ;;  %v56_v9 = vpack.c.bf16 %v44_v5, %v40_v4  ;;  %v4422_v10 = vld [vmem:[#allocation3 + $0x224] ss:$16 sps:$4 sm:$0xff]   ;;  %4956 = vst [vmem:[#allocation13_spill] sm:$0xff] %v4430_v13  ;;  %4958 = vst [vmem:[#allocation15_spill] sm:$0xff] %v4438_v15 }
  0x41   :  { %877 = vmatpush1.bf16.msra.mxu0 %v4296_v26  ;;  %983 = vmatpush1.bf16.msra.mxu1 %v4298_v27  ;;  %v4428_v12 = vld [vmem:[#allocation3 + $0x220] ss:$16 sps:$4 sm:$0xff]   ;;  %v4434_v14 = vld [vmem:[#allocation3 + $0x244] ss:$16 sps:$4 sm:$0xff]   ;;  %v4442_v17 = vld [vmem:[#allocation3 + $0x248] ss:$16 sps:$4 sm:$0xff]   ;;  %p4215_p5 = por %p4214_p4, %p4213_p3 }
  0x42   :  { %878 = vmatprep.subr.bf16.mxu0 %v4302_v28  ;;  %984 = vmatprep.subr.bf16.mxu1 %v4306_v29  ;;  %4955 = vst [vmem:[#allocation12_spill] sm:$0xff] %v4428_v12  ;;  %4957 = vst [vmem:[#allocation14_spill] sm:$0xff] %v4434_v14  ;;  %v4440_v16 = vld [vmem:[#allocation3 + $0x240] ss:$16 sps:$4 sm:$0xff]   ;;  %v4446_v18 = vld [vmem:[#allocation3 + $0x264] ss:$16 sps:$4 sm:$0xff]  }
  0x43   :  { %4959 = vst [vmem:[#allocation16_spill] sm:$0xff] %v4440_v16  ;;  %4960 = vst [vmem:[#allocation17_spill] sm:$0xff] %v4442_v17  ;;  %v4450_v19 = vld [vmem:[#allocation3 + $0x26c] ss:$16 sps:$4 sm:$0xff]   ;;  %v4452_v20 = vld [vmem:[#allocation3 + $0x260] ss:$16 sps:$4 sm:$0xff]   ;;  %p4216_p6 = pnand %p4215_p5, %p4209_p2 }
  0x44   :  { %4961 = vst [vmem:[#allocation18_spill] sm:$0xff] %v4446_v18  ;;  %4962 = vst [vmem:[#allocation19_spill] sm:$0xff] %v4450_v19  ;;  %v4454_v46 = vld [vmem:[#allocation3 + $0x268] ss:$16 sps:$4 sm:$0xff]   ;;  %v4458_v47 = vld [vmem:[#allocation3 + $0x284] ss:$16 sps:$4 sm:$0xff]  }
  0x45   :  { %879 = vmatpush1.bf16.msra.mxu0 %v4308_v30  ;;  %985 = vmatpush1.bf16.msra.mxu1 %v4312_v31  ;;  %4963 = vst [vmem:[#allocation20_spill] sm:$0xff] %v4452_v20  ;;  %4964 = vst [vmem:[#allocation21_spill] sm:$0xff] %v4454_v46  ;;  %v4462_v50 = vld [vmem:[#allocation3 + $0x28c] ss:$16 sps:$4 sm:$0xff]   ;;  %v4464_v4 = vld [vmem:[#allocation3 + $0x280] ss:$16 sps:$4 sm:$0xff]  }
  0x46   :  { %880 = vmatprep.subr.bf16.mxu0 %v4314_v32  ;;  %986 = vmatprep.subr.bf16.mxu1 %v4318_v33  ;;  %4965 = vst [vmem:[#allocation22_spill] sm:$0xff] %v4462_v50  ;;  %4966 = vst [vmem:[#allocation23_spill] sm:$0xff] %v4464_v4  ;;  %v4466_v5 = vld [vmem:[#allocation3 + $0x288] ss:$16 sps:$4 sm:$0xff]  }
  0x47   :  { %4967 = vst [vmem:[#allocation24_spill] sm:$0xff] %v4466_v5 }
  0x49   :  { %881 = vmatpush1.bf16.msra.mxu0 %v4320_v34  ;;  %987 = vmatpush1.bf16.msra.mxu1 %v4322_v35 }
  0x4a   :  { %882 = vmatprep.subr.bf16.mxu0 %v4326_v36  ;;  %988 = vmatprep.subr.bf16.mxu1 %v4330_v37 }
  0x4d   :  { %883 = vmatpush1.bf16.msra.mxu0 %v4332_v38  ;;  %989 = vmatpush1.bf16.msra.mxu1 %v4336_v39 }
  0x4e   :  { %884 = vmatprep.subr.bf16.mxu0 %v4338_v40  ;;  %990 = vmatprep.subr.bf16.mxu1 %v4342_v41 }
  0x51   :  { %885 = vmatpush1.bf16.msra.mxu0 %v4344_v42  ;;  %991 = vmatpush1.bf16.msra.mxu1 %v4346_v43 }
  0x52   :  { %886 = vmatprep.subr.bf16.mxu0 %v4350_v44  ;;  %992 = vmatprep.subr.bf16.mxu1 %v4354_v45 }
  0x55   :  { %887 = vmatpush1.bf16.msra.mxu0 %v4358_v48  ;;  %993 = vmatpush1.bf16.msra.mxu1 %v4360_v49 }
  0x56   :  { %888 = vmatprep.subr.bf16.mxu0 %v4364_v51  ;;  %994 = vmatprep.subr.bf16.mxu1 %v4366_v52 }
  0x59   :  { %889 = vmatpush1.bf16.msra.mxu0 %v4368_v53  ;;  %995 = vmatpush1.bf16.msra.mxu1 %v4370_v54 }
  0x5a   :  { %890 = vmatprep.subr.bf16.mxu0 %v4374_v55  ;;  %996 = vmatprep.subr.bf16.mxu1 %v4378_v56 }
  0x5d   :  { %891 = vmatpush1.bf16.msra.mxu0 %v4380_v57  ;;  %997 = vmatpush1.bf16.msra.mxu1 %v4382_v58 }
  0x5e   :  { %892 = vmatprep.subr.bf16.mxu0 %v4386_v59  ;;  %998 = vmatprep.subr.bf16.mxu1 %v4390_v60 }
  0x61   :  { %893 = vmatpush1.bf16.msra.mxu0 %v4392_v61  ;;  %999 = vmatpush1.bf16.msra.mxu1 %v4394_v62 }
  0x62   :  { %894 = vmatprep.subr.bf16.mxu0 %v4398_v63  ;;  %1000 = vmatprep.subr.bf16.mxu1 %v4402_v0 }
  0x65   :  { %895 = vmatpush1.bf16.msra.mxu0 %v4404_v1  ;;  %1001 = vmatpush1.bf16.msra.mxu1 %v4406_v2 }
  0x66   :  { %917 = vmatprep.subr.bf16.mxu0 %v4408_v3  ;;  %1023 = vmatprep.subr.bf16.mxu1 %v4414_v6 }
  0x68   :  { %897 = vmatmul.mubr.bf16.vlgmr.msra.gmra.mrb[0].mxu0 %v56_v9  ;;  %1003 = vmatmul.mubr.bf16.vlgmr.msra.gmra.mrb[0].mxu1 %v56_v9  ;;  %v4470_v9 = vld [vmem:[#allocation3 + $0x2a4] ss:$16 sps:$4 sm:$0xff]  }
  0x69   :  { %918 = vmatpush1.bf16.msra.mxu0 %v4416_v7  ;;  %1024 = vmatpush1.bf16.msra.mxu1 %v4418_v8  ;;  %4968 = vst [vmem:[#allocation25_spill] sm:$0xff] %v4470_v9 }
  0x6a   :  { %919 = vmatprep.subr.bf16.mxu0 %v4422_v10  ;;  %1025 = vmatprep.subr.bf16.mxu1 %v4426_v11 }
  0x6d   :  { %920 = vmatpush1.bf16.msra.mxu0 %v4428_v12  ;;  %1026 = vmatpush1.bf16.msra.mxu1 %v4430_v13  ;;  %v4476_v13 = vld [vmem:[#allocation3 + $0x2a0] ss:$16 sps:$4 sm:$0xff]   ;;  %v4478_v12 = vld [vmem:[#allocation3 + $0x2a8] ss:$16 sps:$4 sm:$0xff]  }
  0x6e   :  { %921 = vmatprep.subr.bf16.mxu0 %v4434_v14  ;;  %1027 = vmatprep.subr.bf16.mxu1 %v4438_v15  ;;  %v48_v15 = vld [vmem:[#allocation6 + $0x40] sm:$0xff]  ;;  %4970 = vst [vmem:[#allocation27_spill] sm:$0xff] %v4476_v13  ;;  %4971 = vst [vmem:[#allocation28_spill] sm:$0xff] %v4478_v12 }
  0x6f   :  { %v52_v14 = vld [vmem:[#allocation6 + $0x60] sm:$0xff] }
  0x71   :  { %922 = vmatpush1.bf16.msra.mxu0 %v4440_v16  ;;  %1028 = vmatpush1.bf16.msra.mxu1 %v4442_v17  ;;  %v4474_v17 = vld [vmem:[#allocation3 + $0x2ac] ss:$16 sps:$4 sm:$0xff]  }
  0x72   :  { %923 = vmatprep.subr.bf16.mxu0 %v4446_v18  ;;  %1029 = vmatprep.subr.bf16.mxu1 %v4450_v19  ;;  %4969 = vst [vmem:[#allocation26_spill] sm:$0xff] %v4474_v17  ;;  %v49_v18 = vld [vmem:[#allocation6 + $0x48] sm:$0xff] }
  0x73   :  { %v53_v19 = vld [vmem:[#allocation6 + $0x68] sm:$0xff] }
  0x74   :  { %v61_v16 = vpack.c.bf16 %v53_v19, %v49_v18  ;;  %v4488_v18 = vld [vmem:[#allocation3 + $0x2c0] ss:$16 sps:$4 sm:$0xff]   ;;  %v47_v19 = vld [vmem:[#allocation6 + $0x38] sm:$0xff] }
  0x75   :  { %924 = vmatpush1.bf16.msra.mxu0 %v4452_v20  ;;  %1030 = vmatpush1.bf16.msra.mxu1 %v4454_v46  ;;  %v60_v20 = vpack.c.bf16 %v52_v14, %v48_v15  ;;  %v4482_v46 = vld [vmem:[#allocation3 + $0x2c4] ss:$16 sps:$4 sm:$0xff]   ;;  %4974 = vst [vmem:[#allocation31_spill] sm:$0xff] %v4488_v18  ;;  %v4492_v14 = vld [vmem:[#allocation3 + $0x2c8] ss:$16 sps:$4 sm:$0xff]  }
  0x76   :  { %925 = vmatprep.subr.bf16.mxu0 %v4458_v47  ;;  %1031 = vmatprep.subr.bf16.mxu1 %v4462_v50  ;;  %4972 = vst [vmem:[#allocation29_spill] sm:$0xff] %v4482_v46  ;;  %v4486_v50 = vld [vmem:[#allocation3 + $0x2cc] ss:$16 sps:$4 sm:$0xff]   ;;  %4975 = vst [vmem:[#allocation32_spill] sm:$0xff] %v4492_v14 }
  0x77   :  { %4973 = vst [vmem:[#allocation30_spill] sm:$0xff] %v4486_v50  ;;  %906 = vmatprep.mubr.bf16.mxu0 %v61_v16  ;;  %1012 = vmatprep.mubr.bf16.mxu1 %v61_v16  ;;  %v43_v15 = vld [vmem:[#allocation6 + $0x18] sm:$0xff] }
  0x78   :  { %907 = vmatmul.mubr.bf16.gmra.mrb[4].mxu0 %v60_v20  ;;  %1013 = vmatmul.mubr.bf16.gmra.mrb[4].mxu1 %v60_v20  ;;  %v59_v16 = vpack.c.bf16 %v47_v19, %v43_v15  ;;  %v4502_v20 = vld [vmem:[#allocation3 + $0x2e8] ss:$16 sps:$4 sm:$0xff]   ;;  %v4516_v19 = vld [vmem:[#allocation3 + $0x324] ss:$16 sps:$4 sm:$0xff]  }
  0x79   :  { %926 = vmatpush1.bf16.msra.mxu0 %v4464_v4  ;;  %1032 = vmatpush1.bf16.msra.mxu1 %v4466_v5  ;;  %v4500_v5 = vld [vmem:[#allocation3 + $0x2e0] ss:$16 sps:$4 sm:$0xff]   ;;  %4979 = vst [vmem:[#allocation36_spill] sm:$0xff] %v4502_v20  ;;  %v4514_v15 = vld [vmem:[#allocation3 + $0x308] ss:$16 sps:$4 sm:$0xff]   ;;  %4984 = vst [vmem:[#allocation41_spill] sm:$0xff] %v4516_v19 }
  0x7a   :  { %927 = vmatprep.subr.bf16.mxu0 %v4470_v9  ;;  %1033 = vmatprep.subr.bf16.mxu1 %v4474_v17  ;;  %v4496_v17 = vld [vmem:[#allocation3 + $0x2e4] ss:$16 sps:$4 sm:$0xff]   ;;  %v4498_v9 = vld [vmem:[#allocation3 + $0x2ec] ss:$16 sps:$4 sm:$0xff]   ;;  %4978 = vst [vmem:[#allocation35_spill] sm:$0xff] %v4500_v5  ;;  %4983 = vst [vmem:[#allocation40_spill] sm:$0xff] %v4514_v15 }
  0x7b   :  { %4976 = vst [vmem:[#allocation33_spill] sm:$0xff] %v4496_v17  ;;  %4977 = vst [vmem:[#allocation34_spill] sm:$0xff] %v4498_v9  ;;  %949 = vmatprep.mubr.bf16.mxu0 %v59_v16  ;;  %1055 = vmatprep.mubr.bf16.mxu1 %v59_v16  ;;  %v4524_v16 = vld [vmem:[#allocation3 + $0x320] ss:$16 sps:$4 sm:$0xff]   ;;  %v4606_v4 = vld [vmem:[#allocation6 + $0x78] sm:$0xff] }
  0x7c   :  { %4986 = vst [vmem:[#allocation43_spill] sm:$0xff] %v4524_v16  ;;  %5013 = vst [vmem:[#allocation70_spill] sm:$0xff] %v4606_v4 }
  0x7d   :  { %928 = vmatpush1.bf16.msra.mxu0 %v4476_v13  ;;  %1034 = vmatpush1.bf16.msra.mxu1 %v4478_v12  ;;  %v4504_v13 = vld [vmem:[#allocation3 + $0x304] ss:$16 sps:$4 sm:$0xff]   ;;  %v4506_v12 = vld [vmem:[#allocation3 + $0x30c] ss:$16 sps:$4 sm:$0xff]  }
  0x7e   :  { %929 = vmatprep.subr.bf16.mxu0 %v4482_v46  ;;  %1035 = vmatprep.subr.bf16.mxu1 %v4486_v50  ;;  %4980 = vst [vmem:[#allocation37_spill] sm:$0xff] %v4504_v13  ;;  %4981 = vst [vmem:[#allocation38_spill] sm:$0xff] %v4506_v12  ;;  %v4512_v50 = vld [vmem:[#allocation3 + $0x300] ss:$16 sps:$4 sm:$0xff]   ;;  %v4518_v46 = vld [vmem:[#allocation3 + $0x32c] ss:$16 sps:$4 sm:$0xff]  }
  0x7f   :  { %4982 = vst [vmem:[#allocation39_spill] sm:$0xff] %v4512_v50  ;;  %4985 = vst [vmem:[#allocation42_spill] sm:$0xff] %v4518_v46 }
  0x81   :  { %930 = vmatpush1.bf16.msra.mxu0 %v4488_v18  ;;  %1036 = vmatpush1.bf16.msra.mxu1 %v4492_v14  ;;  %v4530_v14 = vld [vmem:[#allocation3 + $0x34c] ss:$16 sps:$4 sm:$0xff]  }
  0x82   :  { %931 = vmatprep.subr.bf16.mxu0 %v4496_v17  ;;  %1037 = vmatprep.subr.bf16.mxu1 %v4498_v9  ;;  %v4526_v17 = vld [vmem:[#allocation3 + $0x328] ss:$16 sps:$4 sm:$0xff]   ;;  %v4528_v9 = vld [vmem:[#allocation3 + $0x344] ss:$16 sps:$4 sm:$0xff]   ;;  %4989 = vst [vmem:[#allocation46_spill] sm:$0xff] %v4530_v14 }
  0x83   :  { %4987 = vst [vmem:[#allocation44_spill] sm:$0xff] %v4526_v17  ;;  %4988 = vst [vmem:[#allocation45_spill] sm:$0xff] %v4528_v9  ;;  %v4604_v18 = vld [vmem:[#allocation6 + $0x58] sm:$0xff] }
  0x84   :  { %5012 = vst [vmem:[#allocation69_spill] sm:$0xff] %v4604_v18 }
  0x85   :  { %932 = vmatpush1.bf16.msra.mxu0 %v4500_v5  ;;  %1038 = vmatpush1.bf16.msra.mxu1 %v4502_v20  ;;  %v4536_v20 = vld [vmem:[#allocation3 + $0x340] ss:$16 sps:$4 sm:$0xff]   ;;  %v4542_v5 = vld [vmem:[#allocation3 + $0x36c] ss:$16 sps:$4 sm:$0xff]  }
  0x86   :  { %933 = vmatprep.subr.bf16.mxu0 %v4504_v13  ;;  %1039 = vmatprep.subr.bf16.mxu1 %v4506_v12  ;;  %4990 = vst [vmem:[#allocation47_spill] sm:$0xff] %v4536_v20  ;;  %v4538_v13 = vld [vmem:[#allocation3 + $0x348] ss:$16 sps:$4 sm:$0xff]   ;;  %v4540_v12 = vld [vmem:[#allocation3 + $0x364] ss:$16 sps:$4 sm:$0xff]   ;;  %4993 = vst [vmem:[#allocation50_spill] sm:$0xff] %v4542_v5 }
  0x87   :  { %4991 = vst [vmem:[#allocation48_spill] sm:$0xff] %v4538_v13  ;;  %4992 = vst [vmem:[#allocation49_spill] sm:$0xff] %v4540_v12 }
  0x89   :  { %934 = vmatpush1.bf16.msra.mxu0 %v4512_v50  ;;  %1040 = vmatpush1.bf16.msra.mxu1 %v4514_v15  ;;  %v4548_v15 = vld [vmem:[#allocation3 + $0x360] ss:$16 sps:$4 sm:$0xff]   ;;  %v4554_v50 = vld [vmem:[#allocation3 + $0x38c] ss:$16 sps:$4 sm:$0xff]  }
  0x8a   :  { %935 = vmatprep.subr.bf16.mxu0 %v4516_v19  ;;  %1041 = vmatprep.subr.bf16.mxu1 %v4518_v46  ;;  %4994 = vst [vmem:[#allocation51_spill] sm:$0xff] %v4548_v15  ;;  %v4550_v19 = vld [vmem:[#allocation3 + $0x368] ss:$16 sps:$4 sm:$0xff]   ;;  %v4552_v46 = vld [vmem:[#allocation3 + $0x384] ss:$16 sps:$4 sm:$0xff]   ;;  %4997 = vst [vmem:[#allocation54_spill] sm:$0xff] %v4554_v50 }
  0x8b   :  { %4995 = vst [vmem:[#allocation52_spill] sm:$0xff] %v4550_v19  ;;  %4996 = vst [vmem:[#allocation53_spill] sm:$0xff] %v4552_v46 }
  0x8d   :  { %936 = vmatpush1.bf16.msra.mxu0 %v4524_v16  ;;  %1042 = vmatpush1.bf16.msra.mxu1 %v4526_v17  ;;  %v4560_v17 = vld [vmem:[#allocation3 + $0x380] ss:$16 sps:$4 sm:$0xff]   ;;  %v4566_v16 = vld [vmem:[#allocation3 + $0x3ac] ss:$16 sps:$4 sm:$0xff]  }
  0x8e   :  { %937 = vmatprep.subr.bf16.mxu0 %v4528_v9  ;;  %1043 = vmatprep.subr.bf16.mxu1 %v4530_v14  ;;  %4998 = vst [vmem:[#allocation55_spill] sm:$0xff] %v4560_v17  ;;  %v4562_v9 = vld [vmem:[#allocation3 + $0x388] ss:$16 sps:$4 sm:$0xff]   ;;  %v4564_v14 = vld [vmem:[#allocation3 + $0x3a4] ss:$16 sps:$4 sm:$0xff]   ;;  %5001 = vst [vmem:[#allocation58_spill] sm:$0xff] %v4566_v16 }
  0x8f   :  { %4999 = vst [vmem:[#allocation56_spill] sm:$0xff] %v4562_v9  ;;  %5000 = vst [vmem:[#allocation57_spill] sm:$0xff] %v4564_v14 }
  0x91   :  { %938 = vmatpush1.bf16.msra.mxu0 %v4536_v20  ;;  %1044 = vmatpush1.bf16.msra.mxu1 %v4538_v13  ;;  %v4572_v13 = vld [vmem:[#allocation3 + $0x3a0] ss:$16 sps:$4 sm:$0xff]   ;;  %v4578_v20 = vld [vmem:[#allocation3 + $0x3cc] ss:$16 sps:$4 sm:$0xff]  }
  0x92   :  { %939 = vmatprep.subr.bf16.mxu0 %v4540_v12  ;;  %1045 = vmatprep.subr.bf16.mxu1 %v4542_v5  ;;  %5002 = vst [vmem:[#allocation59_spill] sm:$0xff] %v4572_v13  ;;  %v4574_v12 = vld [vmem:[#allocation3 + $0x3a8] ss:$16 sps:$4 sm:$0xff]   ;;  %v4576_v5 = vld [vmem:[#allocation3 + $0x3c4] ss:$16 sps:$4 sm:$0xff]   ;;  %5005 = vst [vmem:[#allocation62_spill] sm:$0xff] %v4578_v20 }
  0x93   :  { %5003 = vst [vmem:[#allocation60_spill] sm:$0xff] %v4574_v12  ;;  %5004 = vst [vmem:[#allocation61_spill] sm:$0xff] %v4576_v5 }
  0x95   :  { %940 = vmatpush1.bf16.msra.mxu0 %v4548_v15  ;;  %1046 = vmatpush1.bf16.msra.mxu1 %v4550_v19  ;;  %v4584_v19 = vld [vmem:[#allocation3 + $0x3c0] ss:$16 sps:$4 sm:$0xff]   ;;  %v4590_v15 = vld [vmem:[#allocation3 + $0x3ec] ss:$16 sps:$4 sm:$0xff]  }
  0x96   :  { %941 = vmatprep.subr.bf16.mxu0 %v4552_v46  ;;  %1047 = vmatprep.subr.bf16.mxu1 %v4554_v50  ;;  %5006 = vst [vmem:[#allocation63_spill] sm:$0xff] %v4584_v19  ;;  %v4586_v46 = vld [vmem:[#allocation3 + $0x3c8] ss:$16 sps:$4 sm:$0xff]   ;;  %v4588_v50 = vld [vmem:[#allocation3 + $0x3e4] ss:$16 sps:$4 sm:$0xff]  }
  0x97   :  { %5007 = vst [vmem:[#allocation64_spill] sm:$0xff] %v4586_v46 }
  0x99   :  { %942 = vmatpush1.bf16.msra.mxu0 %v4560_v17  ;;  %1048 = vmatpush1.bf16.msra.mxu1 %v4562_v9  ;;  %v4596_v9 = vld [vmem:[#allocation3 + $0x3e0] ss:$16 sps:$4 sm:$0xff]  }
  0x9a   :  { %943 = vmatprep.subr.bf16.mxu0 %v4564_v14  ;;  %1049 = vmatprep.subr.bf16.mxu1 %v4566_v16  ;;  %5008 = vst [vmem:[#allocation65_spill] sm:$0xff] %v4596_v9  ;;  %v4598_v14 = vld [vmem:[#allocation3 + $0x3e8] ss:$16 sps:$4 sm:$0xff]   ;;  %v4600_v16 = vld [vmem:[#allocation6 + $0x10] sm:$0xff] }
  0x9b   :  { %5009 = vst [vmem:[#allocation66_spill] sm:$0xff] %v4598_v14  ;;  %5010 = vst [vmem:[#allocation67_spill] sm:$0xff] %v4600_v16  ;;  %v4602_v17 = vld [vmem:[#allocation6 + $0x30] sm:$0xff] }
  0x9c   :  { %5011 = vst [vmem:[#allocation68_spill] sm:$0xff] %v4602_v17 }
  0x9d   :  { %944 = vmatpush1.bf16.msra.mxu0 %v4572_v13  ;;  %1050 = vmatpush1.bf16.msra.mxu1 %v4574_v12  ;;  %v4133_v12 = vld [vmem:[#allocation3 + $0x4] ss:$16 sps:$4 sm:$0xff]   ;;  %v4134_v13 = vld [vmem:[#allocation3 + $0xc] ss:$16 sps:$4 sm:$0xff]  }
  0x9e   :  { %945 = vmatprep.subr.bf16.mxu0 %v4576_v5  ;;  %1051 = vmatprep.subr.bf16.mxu1 %v4578_v20  ;;  %v58_v20 = vpack.c.bf16 %v4602_v17, %v4600_v16  ;;  %v63_v5 = vpack.c.bf16 %v4606_v4, %v4604_v18  ;;  %v4135_v17 = vld [vmem:[#allocation3] ss:$16 sps:$4 sm:$0xff]   ;;  %v4136_v16 = vld [vmem:[#allocation3 + $0x8] ss:$16 sps:$4 sm:$0xff]   ;;  %v4141_v18 = vld [vmem:[#allocation3 + $0x44] ss:$16 sps:$4 sm:$0xff]  }
  0x9f   :  { %v4140_v4 = vld [vmem:[#allocation3 + $0x28] ss:$16 sps:$4 sm:$0xff]  }
  0xa1   :  { %946 = vmatpush1.bf16.msra.mxu0 %v4584_v19  ;;  %1052 = vmatpush1.bf16.msra.mxu1 %v4586_v46  ;;  %v4618_v19 = vld [vmem:[#allocation6 + $0x50] sm:$0xff] }
  0xa2   :  { %947 = vmatprep.subr.bf16.mxu0 %v4588_v50  ;;  %1053 = vmatprep.subr.bf16.mxu1 %v4590_v15  ;;  %v4620_v46 = vld [vmem:[#allocation6 + $0x70] sm:$0xff] }
  0xa3   :  { %5014 = vst [vmem:[#allocation71_spill] sm:$0xff] %v4620_v46 }
  0xa5   :  { %948 = vmatpush1.bf16.msra.mxu0 %v4596_v9  ;;  %1054 = vmatpush1.bf16.msra.mxu1 %v4598_v14  ;;  %v4137_v14 = vld [vmem:[#allocation3 + $0x24] ss:$16 sps:$4 sm:$0xff]   ;;  %v4138_v9 = vld [vmem:[#allocation3 + $0x2c] ss:$16 sps:$4 sm:$0xff]  }
  0xa6   :  { %1916 = vmatprep.subr.bf16.mxu0 %v4133_v12  ;;  %2022 = vmatprep.subr.bf16.mxu1 %v4134_v13  ;;  %v62_v12 = vpack.c.bf16 %v4620_v46, %v4618_v19  ;;  %v4139_v13 = vld [vmem:[#allocation3 + $0x20] ss:$16 sps:$4 sm:$0xff]   ;;  %v4148_v46 = vld [vmem:[#allocation3 + $0x68] ss:$16 sps:$4 sm:$0xff]  }
  0xa8   :  { %950 = vmatmul.mubr.bf16.vlgmr.msra.gmra.mrb[0].mxu0 %v58_v20  ;;  %1056 = vmatmul.mubr.bf16.vlgmr.msra.gmra.mrb[0].mxu1 %v58_v20  ;;  %v4142_v20 = vld [vmem:[#allocation3 + $0x4c] ss:$16 sps:$4 sm:$0xff]  }
  0xa9   :  { %959 = vmatprep.mubr.bf16.mxu0 %v63_v5  ;;  %1065 = vmatprep.mubr.bf16.mxu1 %v63_v5  ;;  %v4144_v5 = vld [vmem:[#allocation3 + $0x48] ss:$16 sps:$4 sm:$0xff]  }
  0xaa   :  { %1917 = vmatpush1.bf16.msra.mxu0 %v4135_v17  ;;  %2023 = vmatpush1.bf16.msra.mxu1 %v4136_v16  ;;  %v4143_v17 = vld [vmem:[#allocation3 + $0x40] ss:$16 sps:$4 sm:$0xff]  }
  0xab   :  { %1918 = vmatprep.subr.bf16.mxu0 %v4137_v14  ;;  %2024 = vmatprep.subr.bf16.mxu1 %v4138_v9  ;;  %v4145_v14 = vld [vmem:[#allocation3 + $0x64] ss:$16 sps:$4 sm:$0xff]   ;;  %v4146_v9 = vld [vmem:[#allocation3 + $0x6c] ss:$16 sps:$4 sm:$0xff]   ;;  %v4147_v16 = vld [vmem:[#allocation3 + $0x60] ss:$16 sps:$4 sm:$0xff]  }
  0xae   :  { %1919 = vmatpush1.bf16.msra.mxu0 %v4139_v13  ;;  %2025 = vmatpush1.bf16.msra.mxu1 %v4140_v4  ;;  %v4149_v13 = vld [vmem:[#allocation3 + $0x84] ss:$16 sps:$4 sm:$0xff]   ;;  %v4150_v4 = vld [vmem:[#allocation3 + $0x8c] ss:$16 sps:$4 sm:$0xff]  }
  0xaf   :  { %1920 = vmatprep.subr.bf16.mxu0 %v4141_v18  ;;  %2026 = vmatprep.subr.bf16.mxu1 %v4142_v20  ;;  %v4151_v18 = vld [vmem:[#allocation3 + $0x80] ss:$16 sps:$4 sm:$0xff]   ;;  %v4152_v20 = vld [vmem:[#allocation3 + $0x88] ss:$16 sps:$4 sm:$0xff]  }
  0xb0   :  { %960 = vmatmul.mubr.bf16.gmra.mrb[4].mxu0 %v62_v12  ;;  %1066 = vmatmul.mubr.bf16.gmra.mrb[4].mxu1 %v62_v12  ;;  %v4153_v12 = vld [vmem:[#allocation3 + $0xa4] ss:$16 sps:$4 sm:$0xff]  }
  0xb2   :  { %1921 = vmatpush1.bf16.msra.mxu0 %v4143_v17  ;;  %2027 = vmatpush1.bf16.msra.mxu1 %v4144_v5  ;;  %v5042_v17 = vld [vmem:[#allocation39_spill] sm:$0xff]  ;;  %v5043_v5 = vld [vmem:[#allocation40_spill] sm:$0xff] }
  0xb3   :  { %1922 = vmatprep.subr.bf16.mxu0 %v4145_v14  ;;  %2028 = vmatprep.subr.bf16.mxu1 %v4146_v9  ;;  %v5044_v14 = vld [vmem:[#allocation41_spill] sm:$0xff]  ;;  %v5045_v9 = vld [vmem:[#allocation42_spill] sm:$0xff] }
  0xb6   :  { %1923 = vmatpush1.bf16.msra.mxu0 %v4147_v16  ;;  %2029 = vmatpush1.bf16.msra.mxu1 %v4148_v46  ;;  %v5040_v46 = vld [vmem:[#allocation37_spill] sm:$0xff]  ;;  %v5046_v16 = vld [vmem:[#allocation43_spill] sm:$0xff] }
  0xb7   :  { %1924 = vmatprep.subr.bf16.mxu0 %v4149_v13  ;;  %2030 = vmatprep.subr.bf16.mxu1 %v4150_v4  ;;  %v5047_v13 = vld [vmem:[#allocation44_spill] sm:$0xff]  ;;  %v5048_v4 = vld [vmem:[#allocation45_spill] sm:$0xff] }
  0xba   :  { %1925 = vmatpush1.bf16.msra.mxu0 %v4151_v18  ;;  %2031 = vmatpush1.bf16.msra.mxu1 %v4152_v20  ;;  %v5049_v18 = vld [vmem:[#allocation46_spill] sm:$0xff]  ;;  %v5050_v20 = vld [vmem:[#allocation47_spill] sm:$0xff] }
  0xbb   :  { %1926 = vmatprep.subr.bf16.mxu0 %v4153_v12  ;;  %2032 = vmatprep.subr.bf16.mxu1 %v4285_v21  ;;  %v5051_v12 = vld [vmem:[#allocation48_spill] sm:$0xff] }
  0xbe   :  { %1927 = vmatpush1.bf16.msra.mxu0 %v4287_v22  ;;  %2033 = vmatpush1.bf16.msra.mxu1 %v4289_v23 }
  0xbf   :  { %1928 = vmatprep.subr.bf16.mxu0 %v4291_v24  ;;  %2034 = vmatprep.subr.bf16.mxu1 %v4294_v25 }
  0xc2   :  { %1929 = vmatpush1.bf16.msra.mxu0 %v4296_v26  ;;  %2035 = vmatpush1.bf16.msra.mxu1 %v4298_v27 }
  0xc3   :  { %1930 = vmatprep.subr.bf16.mxu0 %v4302_v28  ;;  %2036 = vmatprep.subr.bf16.mxu1 %v4306_v29 }
  0xc6   :  { %1931 = vmatpush1.bf16.msra.mxu0 %v4308_v30  ;;  %2037 = vmatpush1.bf16.msra.mxu1 %v4312_v31 }
  0xc7   :  { %1932 = vmatprep.subr.bf16.mxu0 %v4314_v32  ;;  %2038 = vmatprep.subr.bf16.mxu1 %v4318_v33 }
  0xca   :  { %1933 = vmatpush1.bf16.msra.mxu0 %v4320_v34  ;;  %2039 = vmatpush1.bf16.msra.mxu1 %v4322_v35 }
  0xcb   :  { %1934 = vmatprep.subr.bf16.mxu0 %v4326_v36  ;;  %2040 = vmatprep.subr.bf16.mxu1 %v4330_v37 }
  0xce   :  { %1935 = vmatpush1.bf16.msra.mxu0 %v4332_v38  ;;  %2041 = vmatpush1.bf16.msra.mxu1 %v4336_v39 }
  0xcf   :  { %1936 = vmatprep.subr.bf16.mxu0 %v4338_v40  ;;  %2042 = vmatprep.subr.bf16.mxu1 %v4342_v41 }
  0xd2   :  { %1937 = vmatpush1.bf16.msra.mxu0 %v4344_v42  ;;  %2043 = vmatpush1.bf16.msra.mxu1 %v4346_v43 }
  0xd3   :  { %1938 = vmatprep.subr.bf16.mxu0 %v4350_v44  ;;  %2044 = vmatprep.subr.bf16.mxu1 %v4354_v45  ;;  %v5015_v44 = vld [vmem:[#allocation12_spill] sm:$0xff]  ;;  %v5016_v45 = vld [vmem:[#allocation13_spill] sm:$0xff] }
  0xd6   :  { %1939 = vmatpush1.bf16.msra.mxu0 %v4358_v48  ;;  %2045 = vmatpush1.bf16.msra.mxu1 %v4360_v49  ;;  %v5017_v49 = vld [vmem:[#allocation14_spill] sm:$0xff] }
  0xd7   :  { %1940 = vmatprep.subr.bf16.mxu0 %v4364_v51  ;;  %2046 = vmatprep.subr.bf16.mxu1 %v4366_v52  ;;  %v5018_v51 = vld [vmem:[#allocation15_spill] sm:$0xff]  ;;  %v5019_v52 = vld [vmem:[#allocation16_spill] sm:$0xff] }
  0xda   :  { %1941 = vmatpush1.bf16.msra.mxu0 %v4368_v53  ;;  %2047 = vmatpush1.bf16.msra.mxu1 %v4370_v54  ;;  %v5020_v53 = vld [vmem:[#allocation17_spill] sm:$0xff]  ;;  %v5021_v54 = vld [vmem:[#allocation18_spill] sm:$0xff] }
  0xdb   :  { %1942 = vmatprep.subr.bf16.mxu0 %v4374_v55  ;;  %2048 = vmatprep.subr.bf16.mxu1 %v4378_v56  ;;  %v5022_v55 = vld [vmem:[#allocation19_spill] sm:$0xff]  ;;  %v5023_v56 = vld [vmem:[#allocation20_spill] sm:$0xff] }
  0xde   :  { %1943 = vmatpush1.bf16.msra.mxu0 %v4380_v57  ;;  %2049 = vmatpush1.bf16.msra.mxu1 %v4382_v58  ;;  %v5024_v57 = vld [vmem:[#allocation21_spill] sm:$0xff]  ;;  %v5025_v58 = vld [vmem:[#allocation22_spill] sm:$0xff] }
  0xdf   :  { %1944 = vmatprep.subr.bf16.mxu0 %v4386_v59  ;;  %2050 = vmatprep.subr.bf16.mxu1 %v4390_v60  ;;  %v5026_v59 = vld [vmem:[#allocation23_spill] sm:$0xff]  ;;  %v5027_v60 = vld [vmem:[#allocation24_spill] sm:$0xff] }
  0xe2   :  { %1945 = vmatpush1.bf16.msra.mxu0 %v4392_v61  ;;  %2051 = vmatpush1.bf16.msra.mxu1 %v4394_v62  ;;  %v5028_v61 = vld [vmem:[#allocation25_spill] sm:$0xff]  ;;  %v5029_v62 = vld [vmem:[#allocation26_spill] sm:$0xff] }
  0xe3   :  { %1946 = vmatprep.subr.bf16.mxu0 %v4398_v63  ;;  %2052 = vmatprep.subr.bf16.mxu1 %v4402_v0  ;;  %v5030_v63 = vld [vmem:[#allocation27_spill] sm:$0xff]  ;;  %v5031_v0 = vld [vmem:[#allocation28_spill] sm:$0xff] }
  0xe6   :  { %1947 = vmatpush1.bf16.msra.mxu0 %v4404_v1  ;;  %2053 = vmatpush1.bf16.msra.mxu1 %v4406_v2  ;;  %v5032_v1 = vld [vmem:[#allocation29_spill] sm:$0xff]  ;;  %v5033_v2 = vld [vmem:[#allocation30_spill] sm:$0xff] }
  0xe7   :  { %1969 = vmatprep.subr.bf16.mxu0 %v4408_v3  ;;  %2075 = vmatprep.subr.bf16.mxu1 %v4414_v6  ;;  %v5034_v3 = vld [vmem:[#allocation31_spill] sm:$0xff]  ;;  %v5035_v6 = vld [vmem:[#allocation32_spill] sm:$0xff] }
 0x17b   :  { %v4669_v21 = vpop.f32.mrb[0].mxu0  ;;  %v4671_v22 = vpop.f32.mrb[0].mxu1 }
 0x17c   :  { %v4673_v23 = vpop.f32.mrb[1].mxu0  ;;  %v4675_v24 = vpop.f32.mrb[1].mxu1 }
 0x17d   :  { %v4677_v25 = vpop.f32.mrb[2].mxu0  ;;  %v4679_v26 = vpop.f32.mrb[2].mxu1 }
 0x17e   :  { %v1076_v27 = vpack.c.bf16 %v4677_v25, %v4669_v21  ;;  %v4685_v28 = vpack.c.bf16 %v4679_v26, %v4671_v22  ;;  %v4687_v29 = vpop.f32.mrb[3].mxu0  ;;  %v4689_v30 = vpop.f32.mrb[3].mxu1 }
 0x17f   :  { %v1077_v31 = vpack.c.bf16 %v4687_v29, %v4673_v23  ;;  %v1079_v32 = vpack.c.bf16 %v4689_v30, %v4675_v24 }
 0x181   :  { %1948 = vmatprep.mubr.bf16.mxu0 %v1077_v31  ;;  %2054 = vmatprep.mubr.bf16.mxu1 %v1077_v31  ;;  %v5053_v31 = vld [vmem:[#allocation50_spill] sm:$0xff] }
 0x182   :  { %1949 = vmatmul.mubr.bf16.vlgmr.msra.gmra.mrb[8].mxu0 %v1076_v27  ;;  %2055 = vmatmul.mubr.bf16.vlgmr.msra.gmra.mrb[8].mxu1 %v1076_v27  ;;  %v5052_v27 = vld [vmem:[#allocation49_spill] sm:$0xff] }
 0x183   :  { %1970 = vmatpush1.bf16.msra.mxu0 %v4416_v7  ;;  %2076 = vmatpush1.bf16.msra.mxu1 %v4418_v8  ;;  %v4697_v33 = vpop.f32.mrb[4].mxu0  ;;  %v4699_v34 = vpop.f32.mrb[4].mxu1  ;;  %v5036_v7 = vld [vmem:[#allocation33_spill] sm:$0xff]  ;;  %v5037_v8 = vld [vmem:[#allocation34_spill] sm:$0xff] }
 0x184   :  { %v4701_v35 = vpop.f32.mrb[5].mxu0  ;;  %1971 = vmatprep.subr.bf16.mxu0 %v4422_v10  ;;  %2077 = vmatprep.subr.bf16.mxu1 %v4426_v11  ;;  %v4705_v36 = vpop.f32.mrb[5].mxu1  ;;  %v5038_v10 = vld [vmem:[#allocation35_spill] sm:$0xff]  ;;  %v5039_v11 = vld [vmem:[#allocation36_spill] sm:$0xff] }
 0x185   :  { %v4707_v37 = vpop.f32.mrb[6].mxu0  ;;  %v4709_v38 = vpop.f32.mrb[6].mxu1 }
 0x186   :  { %v1080_v39 = vpack.c.bf16 %v4707_v37, %v4697_v33  ;;  %v4713_v40 = vpop.f32.mrb[7].mxu0  ;;  %v4717_v41 = vpack.c.bf16 %v4709_v38, %v4699_v34  ;;  %v4719_v42 = vpop.f32.mrb[7].mxu1 }
 0x187   :  { %v1081_v43 = vpack.c.bf16 %v4713_v40, %v4701_v35  ;;  %1972 = vmatpush1.bf16.msra.mxu0 %v5015_v44  ;;  %2078 = vmatpush1.bf16.msra.mxu1 %v5016_v45  ;;  %v4727_v48 = vpack.c.bf16 %v4719_v42, %v4705_v36  ;;  %v5057_v44 = vld [vmem:[#allocation54_spill] sm:$0xff]  ;;  %v5058_v45 = vld [vmem:[#allocation55_spill] sm:$0xff] }
 0x188   :  { %1973 = vmatprep.subr.bf16.mxu0 %v5017_v49  ;;  %2079 = vmatprep.subr.bf16.mxu1 %v5018_v51  ;;  %v5059_v49 = vld [vmem:[#allocation56_spill] sm:$0xff]  ;;  %v5060_v51 = vld [vmem:[#allocation57_spill] sm:$0xff] }
 0x189   :  { %1958 = vmatprep.mubr.bf16.mxu0 %v1081_v43  ;;  %2064 = vmatprep.mubr.bf16.mxu1 %v1081_v43  ;;  %v5056_v43 = vld [vmem:[#allocation53_spill] sm:$0xff] }
 0x18a   :  { %1959 = vmatmul.mubr.bf16.gmra.mrb[12].mxu0 %v1080_v39  ;;  %2065 = vmatmul.mubr.bf16.gmra.mrb[12].mxu1 %v1080_v39  ;;  %v5055_v39 = vld [vmem:[#allocation52_spill] sm:$0xff] }
 0x18b   :  { %1974 = vmatpush1.bf16.msra.mxu0 %v5019_v52  ;;  %2080 = vmatpush1.bf16.msra.mxu1 %v5020_v53  ;;  %v5061_v52 = vld [vmem:[#allocation58_spill] sm:$0xff]  ;;  %v5062_v53 = vld [vmem:[#allocation59_spill] sm:$0xff] }
 0x18c   :  { %2001 = vmatprep.mubr.bf16.mxu0 %v1079_v32  ;;  %2107 = vmatprep.mubr.bf16.mxu1 %v1079_v32  ;;  %v5054_v32 = vld [vmem:[#allocation51_spill] sm:$0xff] }
 0x18d   :  { %1975 = vmatprep.subr.bf16.mxu0 %v5021_v54  ;;  %2081 = vmatprep.subr.bf16.mxu1 %v5022_v55  ;;  %v5063_v54 = vld [vmem:[#allocation60_spill] sm:$0xff]  ;;  %v5064_v55 = vld [vmem:[#allocation61_spill] sm:$0xff] }
 0x18f   :  { %1976 = vmatpush1.bf16.msra.mxu0 %v5023_v56  ;;  %2082 = vmatpush1.bf16.msra.mxu1 %v5024_v57  ;;  %v5065_v56 = vld [vmem:[#allocation62_spill] sm:$0xff]  ;;  %v5066_v57 = vld [vmem:[#allocation63_spill] sm:$0xff] }
 0x190   :  { %1977 = vmatprep.subr.bf16.mxu0 %v4458_v47  ;;  %2083 = vmatprep.subr.bf16.mxu1 %v5025_v58  ;;  %v5041_v47 = vld [vmem:[#allocation38_spill] sm:$0xff]  ;;  %v5067_v58 = vld [vmem:[#allocation64_spill] sm:$0xff] }
 0x193   :  { %1978 = vmatpush1.bf16.msra.mxu0 %v5026_v59  ;;  %2084 = vmatpush1.bf16.msra.mxu1 %v5027_v60  ;;  %v3943_v59 = vld [vmem:[#allocation3 + $0x4] ss:$16 sps:$4 sm:$0xff]   ;;  %v3946_v60 = vld [vmem:[#allocation3 + $0xc] ss:$16 sps:$4 sm:$0xff]  }
 0x194   :  { %1979 = vmatprep.subr.bf16.mxu0 %v5028_v61  ;;  %2085 = vmatprep.subr.bf16.mxu1 %v5029_v62  ;;  %v5068_v61 = vld [vmem:[#allocation65_spill] sm:$0xff]  ;;  %v5069_v62 = vld [vmem:[#allocation66_spill] sm:$0xff] }
 0x197   :  { %1980 = vmatpush1.bf16.msra.mxu0 %v5030_v63  ;;  %2086 = vmatpush1.bf16.msra.mxu1 %v5031_v0  ;;  %v3941_v63 = vld [vmem:[#allocation3] ss:$16 sps:$4 sm:$0xff]   ;;  %v3944_v0 = vld [vmem:[#allocation3 + $0x8] ss:$16 sps:$4 sm:$0xff]  }
 0x198   :  { %1981 = vmatprep.subr.bf16.mxu0 %v5032_v1  ;;  %2087 = vmatprep.subr.bf16.mxu1 %v5033_v2  ;;  %v3949_v1 = vld [vmem:[#allocation3 + $0x24] ss:$16 sps:$4 sm:$0xff]   ;;  %v3952_v2 = vld [vmem:[#allocation3 + $0x2c] ss:$16 sps:$4 sm:$0xff]  }
 0x19b   :  { %1982 = vmatpush1.bf16.msra.mxu0 %v5034_v3  ;;  %2088 = vmatpush1.bf16.msra.mxu1 %v5035_v6  ;;  %v3955_v3 = vld [vmem:[#allocation3 + $0x44] ss:$16 sps:$4 sm:$0xff]   ;;  %v3958_v6 = vld [vmem:[#allocation3 + $0x4c] ss:$16 sps:$4 sm:$0xff]  }
 0x19c   :  { %1983 = vmatprep.subr.bf16.mxu0 %v5036_v7  ;;  %2089 = vmatprep.subr.bf16.mxu1 %v5037_v8  ;;  %v3953_v7 = vld [vmem:[#allocation3 + $0x40] ss:$16 sps:$4 sm:$0xff]   ;;  %v3956_v8 = vld [vmem:[#allocation3 + $0x48] ss:$16 sps:$4 sm:$0xff]  }
 0x19f   :  { %1984 = vmatpush1.bf16.msra.mxu0 %v5038_v10  ;;  %2090 = vmatpush1.bf16.msra.mxu1 %v5039_v11  ;;  %v3961_v10 = vld [vmem:[#allocation3 + $0x64] ss:$16 sps:$4 sm:$0xff]   ;;  %v3962_v11 = vld [vmem:[#allocation3 + $0x68] ss:$16 sps:$4 sm:$0xff]  }
 0x1a0   :  { %1985 = vmatprep.subr.bf16.mxu0 %v5040_v46  ;;  %2091 = vmatprep.subr.bf16.mxu1 %v5041_v47  ;;  %v3967_v46 = vld [vmem:[#allocation3 + $0x84] ss:$16 sps:$4 sm:$0xff]   ;;  %v3970_v47 = vld [vmem:[#allocation3 + $0x8c] ss:$16 sps:$4 sm:$0xff]  }
 0x1a3   :  { %1986 = vmatpush1.bf16.msra.mxu0 %v5042_v17  ;;  %2092 = vmatpush1.bf16.msra.mxu1 %v5043_v5  ;;  %v3965_v17 = vld [vmem:[#allocation3 + $0x80] ss:$16 sps:$4 sm:$0xff]   ;;  %v3968_v5 = vld [vmem:[#allocation3 + $0x88] ss:$16 sps:$4 sm:$0xff]  }
 0x1a4   :  { %1987 = vmatprep.subr.bf16.mxu0 %v5044_v14  ;;  %2093 = vmatprep.subr.bf16.mxu1 %v5045_v9  ;;  %v3973_v14 = vld [vmem:[#allocation3 + $0xa4] ss:$16 sps:$4 sm:$0xff]   ;;  %v3976_v9 = vld [vmem:[#allocation3 + $0xac] ss:$16 sps:$4 sm:$0xff]  }
 0x1a7   :  { %1988 = vmatpush1.bf16.msra.mxu0 %v5046_v16  ;;  %2094 = vmatpush1.bf16.msra.mxu1 %v5047_v13  ;;  %v3971_v16 = vld [vmem:[#allocation3 + $0xa0] ss:$16 sps:$4 sm:$0xff]   ;;  %v3979_v13 = vld [vmem:[#allocation3 + $0xc4] ss:$16 sps:$4 sm:$0xff]  }
 0x1a8   :  { %1989 = vmatprep.subr.bf16.mxu0 %v5048_v4  ;;  %2095 = vmatprep.subr.bf16.mxu1 %v5049_v18  ;;  %v3982_v4 = vld [vmem:[#allocation3 + $0xcc] ss:$16 sps:$4 sm:$0xff]   ;;  %v3977_v18 = vld [vmem:[#allocation3 + $0xc0] ss:$16 sps:$4 sm:$0xff]  }
 0x1ab   :  { %1990 = vmatpush1.bf16.msra.mxu0 %v5050_v20  ;;  %2096 = vmatpush1.bf16.msra.mxu1 %v5051_v12  ;;  %v3980_v20 = vld [vmem:[#allocation3 + $0xc8] ss:$16 sps:$4 sm:$0xff]   ;;  %v3985_v12 = vld [vmem:[#allocation3 + $0xe4] ss:$16 sps:$4 sm:$0xff]  }
 0x1ac   :  { %1991 = vmatprep.subr.bf16.mxu0 %v5052_v27  ;;  %2097 = vmatprep.subr.bf16.mxu1 %v5053_v31  ;;  %v3988_v27 = vld [vmem:[#allocation3 + $0xec] ss:$16 sps:$4 sm:$0xff]   ;;  %v3983_v31 = vld [vmem:[#allocation3 + $0xe0] ss:$16 sps:$4 sm:$0xff]  }
 0x1af   :  { %1992 = vmatpush1.bf16.msra.mxu0 %v5054_v32  ;;  %2098 = vmatpush1.bf16.msra.mxu1 %v5055_v39  ;;  %v3986_v32 = vld [vmem:[#allocation3 + $0xe8] ss:$16 sps:$4 sm:$0xff]   ;;  %v3991_v39 = vld [vmem:[#allocation3 + $0x104] ss:$16 sps:$4 sm:$0xff]  }
 0x1b0   :  { %1993 = vmatprep.subr.bf16.mxu0 %v5056_v43  ;;  %2099 = vmatprep.subr.bf16.mxu1 %v5057_v44  ;;  %v3994_v43 = vld [vmem:[#allocation3 + $0x10c] ss:$16 sps:$4 sm:$0xff]   ;;  %v3989_v44 = vld [vmem:[#allocation3 + $0x100] ss:$16 sps:$4 sm:$0xff]  }
 0x1b3   :  { %1994 = vmatpush1.bf16.msra.mxu0 %v5058_v45  ;;  %2100 = vmatpush1.bf16.msra.mxu1 %v5059_v49  ;;  %v3992_v45 = vld [vmem:[#allocation3 + $0x108] ss:$16 sps:$4 sm:$0xff]   ;;  %v3997_v49 = vld [vmem:[#allocation3 + $0x124] ss:$16 sps:$4 sm:$0xff]  }
 0x1b4   :  { %1995 = vmatprep.subr.bf16.mxu0 %v5060_v51  ;;  %2101 = vmatprep.subr.bf16.mxu1 %v5061_v52  ;;  %v4000_v51 = vld [vmem:[#allocation3 + $0x12c] ss:$16 sps:$4 sm:$0xff]   ;;  %v3995_v52 = vld [vmem:[#allocation3 + $0x120] ss:$16 sps:$4 sm:$0xff]  }
 0x1b7   :  { %1996 = vmatpush1.bf16.msra.mxu0 %v5062_v53  ;;  %2102 = vmatpush1.bf16.msra.mxu1 %v5063_v54  ;;  %v3998_v53 = vld [vmem:[#allocation3 + $0x128] ss:$16 sps:$4 sm:$0xff]   ;;  %v4003_v54 = vld [vmem:[#allocation3 + $0x144] ss:$16 sps:$4 sm:$0xff]  }
 0x1b8   :  { %1997 = vmatprep.subr.bf16.mxu0 %v5064_v55  ;;  %2103 = vmatprep.subr.bf16.mxu1 %v5065_v56  ;;  %v4006_v55 = vld [vmem:[#allocation3 + $0x14c] ss:$16 sps:$4 sm:$0xff]   ;;  %v4001_v56 = vld [vmem:[#allocation3 + $0x140] ss:$16 sps:$4 sm:$0xff]  }
 0x1bb   :  { %1998 = vmatpush1.bf16.msra.mxu0 %v5066_v57  ;;  %2104 = vmatpush1.bf16.msra.mxu1 %v5067_v58  ;;  %v4004_v57 = vld [vmem:[#allocation3 + $0x148] ss:$16 sps:$4 sm:$0xff]   ;;  %v4009_v58 = vld [vmem:[#allocation3 + $0x164] ss:$16 sps:$4 sm:$0xff]  }
 0x1bc   :  { %1999 = vmatprep.subr.bf16.mxu0 %v4588_v50  ;;  %2105 = vmatprep.subr.bf16.mxu1 %v4590_v15  ;;  %v3947_v50 = vld [vmem:[#allocation3 + $0x20] ss:$16 sps:$4 sm:$0xff]   ;;  %v3950_v15 = vld [vmem:[#allocation3 + $0x28] ss:$16 sps:$4 sm:$0xff]  }
 0x1bf   :  { %2000 = vmatpush1.bf16.msra.mxu0 %v5068_v61  ;;  %2106 = vmatpush1.bf16.msra.mxu1 %v5069_v62  ;;  %v4010_v61 = vld [vmem:[#allocation3 + $0x168] ss:$16 sps:$4 sm:$0xff]   ;;  %v4015_v62 = vld [vmem:[#allocation3 + $0x184] ss:$16 sps:$4 sm:$0xff]  }
 0x1c0   :  { %2968 = vmatprep.subr.bf16.mxu0 %v3943_v59  ;;  %3074 = vmatprep.subr.bf16.mxu1 %v3946_v60  ;;  %v4012_v59 = vld [vmem:[#allocation3 + $0x16c] ss:$16 sps:$4 sm:$0xff]   ;;  %v4007_v60 = vld [vmem:[#allocation3 + $0x160] ss:$16 sps:$4 sm:$0xff]  }
 0x1c2   :  { %2002 = vmatmul.mubr.bf16.vlgmr.msra.gmra.mrb[8].mxu0 %v4685_v28  ;;  %2108 = vmatmul.mubr.bf16.vlgmr.msra.gmra.mrb[8].mxu1 %v4685_v28  ;;  %v3964_v28 = vld [vmem:[#allocation3 + $0x6c] ss:$16 sps:$4 sm:$0xff]  }
 0x1c3   :  { %2011 = vmatprep.mubr.bf16.mxu0 %v4727_v48  ;;  %2117 = vmatprep.mubr.bf16.mxu1 %v4727_v48  ;;  %v3959_v48 = vld [vmem:[#allocation3 + $0x60] ss:$16 sps:$4 sm:$0xff]  }
 0x1c4   :  { %2969 = vmatpush1.bf16.msra.mxu0 %v3941_v63  ;;  %3075 = vmatpush1.bf16.msra.mxu1 %v3944_v0  ;;  %v4018_v63 = vld [vmem:[#allocation3 + $0x18c] ss:$16 sps:$4 sm:$0xff]   ;;  %v4013_v0 = vld [vmem:[#allocation3 + $0x180] ss:$16 sps:$4 sm:$0xff]  }
 0x1c5   :  { %2970 = vmatprep.subr.bf16.mxu0 %v3949_v1  ;;  %3076 = vmatprep.subr.bf16.mxu1 %v3952_v2  ;;  %v4016_v1 = vld [vmem:[#allocation3 + $0x188] ss:$16 sps:$4 sm:$0xff]   ;;  %v4021_v2 = vld [vmem:[#allocation3 + $0x1a4] ss:$16 sps:$4 sm:$0xff]  }
 0x1c8   :  { %2971 = vmatpush1.bf16.msra.mxu0 %v3947_v50  ;;  %3077 = vmatpush1.bf16.msra.mxu1 %v3950_v15  ;;  %v4024_v50 = vld [vmem:[#allocation3 + $0x1ac] ss:$16 sps:$4 sm:$0xff]   ;;  %v4019_v15 = vld [vmem:[#allocation3 + $0x1a0] ss:$16 sps:$4 sm:$0xff]  }
 0x1c9   :  { %2972 = vmatprep.subr.bf16.mxu0 %v3955_v3  ;;  %3078 = vmatprep.subr.bf16.mxu1 %v3958_v6  ;;  %v4022_v3 = vld [vmem:[#allocation3 + $0x1a8] ss:$16 sps:$4 sm:$0xff]   ;;  %v4027_v6 = vld [vmem:[#allocation3 + $0x1c4] ss:$16 sps:$4 sm:$0xff]  }
 0x1ca   :  { %2012 = vmatmul.mubr.bf16.gmra.mrb[12].mxu0 %v4717_v41  ;;  %2118 = vmatmul.mubr.bf16.gmra.mrb[12].mxu1 %v4717_v41  ;;  %v3974_v41 = vld [vmem:[#allocation3 + $0xa8] ss:$16 sps:$4 sm:$0xff]  }
 0x1cc   :  { %2973 = vmatpush1.bf16.msra.mxu0 %v3953_v7  ;;  %3079 = vmatpush1.bf16.msra.mxu1 %v3956_v8  ;;  %v4030_v7 = vld [vmem:[#allocation3 + $0x1cc] ss:$16 sps:$4 sm:$0xff]   ;;  %v4025_v8 = vld [vmem:[#allocation3 + $0x1c0] ss:$16 sps:$4 sm:$0xff]  }
 0x1cd   :  { %2974 = vmatprep.subr.bf16.mxu0 %v3961_v10  ;;  %3080 = vmatprep.subr.bf16.mxu1 %v3964_v28  ;;  %v4028_v10 = vld [vmem:[#allocation3 + $0x1c8] ss:$16 sps:$4 sm:$0xff]   ;;  %v4033_v28 = vld [vmem:[#allocation3 + $0x1e4] ss:$16 sps:$4 sm:$0xff]  }
 0x1d0   :  { %2975 = vmatpush1.bf16.msra.mxu0 %v3959_v48  ;;  %3081 = vmatpush1.bf16.msra.mxu1 %v3962_v11  ;;  %v4036_v48 = vld [vmem:[#allocation3 + $0x1ec] ss:$16 sps:$4 sm:$0xff]   ;;  %v4031_v11 = vld [vmem:[#allocation3 + $0x1e0] ss:$16 sps:$4 sm:$0xff]  }
 0x1d1   :  { %2976 = vmatprep.subr.bf16.mxu0 %v3967_v46  ;;  %3082 = vmatprep.subr.bf16.mxu1 %v3970_v47  ;;  %v4034_v46 = vld [vmem:[#allocation3 + $0x1e8] ss:$16 sps:$4 sm:$0xff]   ;;  %v4039_v47 = vld [vmem:[#allocation3 + $0x204] ss:$16 sps:$4 sm:$0xff]  }
 0x1d4   :  { %2977 = vmatpush1.bf16.msra.mxu0 %v3965_v17  ;;  %3083 = vmatpush1.bf16.msra.mxu1 %v3968_v5  ;;  %v4042_v17 = vld [vmem:[#allocation3 + $0x20c] ss:$16 sps:$4 sm:$0xff]   ;;  %v4154_v5 = vld [vmem:[#allocation6] sm:$0xff] }
 0x1d5   :  { %2978 = vmatprep.subr.bf16.mxu0 %v3973_v14  ;;  %3084 = vmatprep.subr.bf16.mxu1 %v3976_v9  ;;  %v1108_v14 = vadd.f32 %v4154_v5, %v4669_v21  ;;  %v5070_v9 = vld [vmem:[#allocation67_spill] sm:$0xff]  ;;  %v4163_v5 = vld [vmem:[#allocation6 + $0x68] sm:$0xff] }
 0x1d8   :  { %2979 = vmatpush1.bf16.msra.mxu0 %v3971_v16  ;;  %3085 = vmatpush1.bf16.msra.mxu1 %v3974_v41  ;;  %v1110_v16 = vadd.f32 %v4671_v22, %v5070_v9  ;;  %v4155_v41 = vld [vmem:[#allocation6 + $0x8] sm:$0xff] }
 0x1d9   :  { %2980 = vmatprep.subr.bf16.mxu0 %v3979_v13  ;;  %3086 = vmatprep.subr.bf16.mxu1 %v3982_v4  ;;  %v1109_v13 = vadd.f32 %v4155_v41, %v4673_v23  ;;  %v4156_v4 = vld [vmem:[#allocation6 + $0x18] sm:$0xff] }
 0x1dc   :  { %2981 = vmatpush1.bf16.msra.mxu0 %v3977_v18  ;;  %3087 = vmatpush1.bf16.msra.mxu1 %v3980_v20  ;;  %v1111_v18 = vadd.f32 %v4156_v4, %v4675_v24 }
 0x1dd   :  { %2982 = vmatprep.subr.bf16.mxu0 %v3985_v12  ;;  %3088 = vmatprep.subr.bf16.mxu1 %v3988_v27  ;;  %v4157_v27 = vld [vmem:[#allocation6 + $0x20] sm:$0xff] }
 0x1e0   :  { %2983 = vmatpush1.bf16.msra.mxu0 %v3983_v31  ;;  %3089 = vmatpush1.bf16.msra.mxu1 %v3986_v32  ;;  %v1112_v31 = vadd.f32 %v4157_v27, %v4677_v25  ;;  %v5071_v32 = vld [vmem:[#allocation68_spill] sm:$0xff] }
 0x1e1   :  { %2984 = vmatprep.subr.bf16.mxu0 %v3991_v39  ;;  %3090 = vmatprep.subr.bf16.mxu1 %v3994_v43  ;;  %v1114_v39 = vadd.f32 %v4679_v26, %v5071_v32  ;;  %v4054_v32 = vld [vmem:[#allocation3 + $0x24c] ss:$16 sps:$4 sm:$0xff]  }
 0x1e4   :  { %2985 = vmatpush1.bf16.msra.mxu0 %v3989_v44  ;;  %3091 = vmatpush1.bf16.msra.mxu1 %v3992_v45  ;;  %v4158_v45 = vld [vmem:[#allocation6 + $0x28] sm:$0xff] }
 0x1e5   :  { %2986 = vmatprep.subr.bf16.mxu0 %v3997_v49  ;;  %3092 = vmatprep.subr.bf16.mxu1 %v4000_v51  ;;  %v1113_v23 = vadd.f32 %v4158_v45, %v4687_v29  ;;  %v4159_v49 = vld [vmem:[#allocation6 + $0x38] sm:$0xff] }
 0x1e6   :  { %v1115_v24 = vadd.f32 %v4159_v49, %v4689_v30  ;;  %v4052_v45 = vld [vmem:[#allocation3 + $0x248] ss:$16 sps:$4 sm:$0xff]   ;;  %v4060_v49 = vld [vmem:[#allocation3 + $0x26c] ss:$16 sps:$4 sm:$0xff]  }
 0x1e8   :  { %2987 = vmatpush1.bf16.msra.mxu0 %v3995_v52  ;;  %3093 = vmatpush1.bf16.msra.mxu1 %v3998_v53 }
 0x1e9   :  { %2988 = vmatprep.subr.bf16.mxu0 %v4003_v54  ;;  %3094 = vmatprep.subr.bf16.mxu1 %v4006_v55 }
 0x1ec   :  { %2989 = vmatpush1.bf16.msra.mxu0 %v4001_v56  ;;  %3095 = vmatpush1.bf16.msra.mxu1 %v4004_v57 }
 0x1ed   :  { %2990 = vmatprep.subr.bf16.mxu0 %v4009_v58  ;;  %3096 = vmatprep.subr.bf16.mxu1 %v4012_v59 }
 0x1f0   :  { %2991 = vmatpush1.bf16.msra.mxu0 %v4007_v60  ;;  %3097 = vmatpush1.bf16.msra.mxu1 %v4010_v61  ;;  %v4037_v61 = vld [vmem:[#allocation3 + $0x200] ss:$16 sps:$4 sm:$0xff]  }
 0x1f1   :  { %2992 = vmatprep.subr.bf16.mxu0 %v4015_v62  ;;  %3098 = vmatprep.subr.bf16.mxu1 %v4018_v63  ;;  %v4040_v62 = vld [vmem:[#allocation3 + $0x208] ss:$16 sps:$4 sm:$0xff]   ;;  %v4045_v63 = vld [vmem:[#allocation3 + $0x224] ss:$16 sps:$4 sm:$0xff]  }
 0x1f4   :  { %2993 = vmatpush1.bf16.msra.mxu0 %v4013_v0  ;;  %3099 = vmatpush1.bf16.msra.mxu1 %v4016_v1  ;;  %v4048_v0 = vld [vmem:[#allocation3 + $0x22c] ss:$16 sps:$4 sm:$0xff]   ;;  %v4160_v1 = vld [vmem:[#allocation6 + $0x40] sm:$0xff] }
 0x1f5   :  { %2994 = vmatprep.subr.bf16.mxu0 %v4021_v2  ;;  %3100 = vmatprep.subr.bf16.mxu1 %v4024_v50  ;;  %v1116_v2 = vadd.f32 %v4160_v1, %v4697_v33  ;;  %v1118_v50 = vadd.f32 %v4699_v34, %v4618_v19  ;;  %v5073_v33 = vld [vmem:[#allocation71_spill] sm:$0xff] }
 0x1f6   :  { %v4078_v1 = vld [vmem:[#allocation3 + $0x2cc] ss:$16 sps:$4 sm:$0xff]  }
 0x1f8   :  { %2995 = vmatpush1.bf16.msra.mxu0 %v4019_v15  ;;  %3101 = vmatpush1.bf16.msra.mxu1 %v4022_v3  ;;  %v4161_v15 = vld [vmem:[#allocation6 + $0x48] sm:$0xff] }
 0x1f9   :  { %2996 = vmatprep.subr.bf16.mxu0 %v4027_v6  ;;  %3102 = vmatprep.subr.bf16.mxu1 %v4030_v7  ;;  %v1117_v3 = vadd.f32 %v4161_v15, %v4701_v35  ;;  %v4162_v6 = vld [vmem:[#allocation6 + $0x60] sm:$0xff]  ;;  %v4084_v15 = vld [vmem:[#allocation3 + $0x2ec] ss:$16 sps:$4 sm:$0xff]  }
 0x1fa   :  { %v1120_v7 = vadd.f32 %v4162_v6, %v4707_v37  ;;  %v4051_v37 = vld [vmem:[#allocation3 + $0x244] ss:$16 sps:$4 sm:$0xff]   ;;  %v4082_v6 = vld [vmem:[#allocation3 + $0x2e8] ss:$16 sps:$4 sm:$0xff]  }
 0x1fc   :  { %2997 = vmatpush1.bf16.msra.mxu0 %v4025_v8  ;;  %3103 = vmatpush1.bf16.msra.mxu1 %v4028_v10  ;;  %v5072_v8 = vld [vmem:[#allocation69_spill] sm:$0xff] }
 0x1fd   :  { %2998 = vmatprep.subr.bf16.mxu0 %v4033_v28  ;;  %3104 = vmatprep.subr.bf16.mxu1 %v4036_v48  ;;  %v1119_v10 = vadd.f32 %v4705_v36, %v5072_v8  ;;  %v1121_v36 = vadd.f32 %v4163_v5, %v4713_v40  ;;  %v4090_v8 = vld [vmem:[#allocation3 + $0x30c] ss:$16 sps:$4 sm:$0xff]   ;;  %v4105_v5 = vld [vmem:[#allocation3 + $0x364] ss:$16 sps:$4 sm:$0xff]  }
 0x200   :  { %2999 = vmatpush1.bf16.msra.mxu0 %v4031_v11  ;;  %3105 = vmatpush1.bf16.msra.mxu1 %v4034_v46  ;;  %v4043_v11 = vld [vmem:[#allocation3 + $0x220] ss:$16 sps:$4 sm:$0xff]   ;;  %v1122_v46 = vadd.f32 %v4709_v38, %v5073_v33 }
 0x201   :  { %3021 = vmatprep.subr.bf16.mxu0 %v4039_v47  ;;  %3127 = vmatprep.subr.bf16.mxu1 %v4042_v17  ;;  %v4046_v17 = vld [vmem:[#allocation3 + $0x228] ss:$16 sps:$4 sm:$0xff]   ;;  %v4091_v33 = vld [vmem:[#allocation3 + $0x320] ss:$16 sps:$4 sm:$0xff]  }
 0x295   :  { %v2003_v20 = vpop.f32.mrb[8].mxu0  ;;  %v2109_v12 = vpop.f32.mrb[8].mxu1 }
 0x296   :  { %v4799_v43 = vadd.f32 %v2003_v20, %v1108_v14  ;;  %v4801_v21 = vadd.f32 %v2109_v12, %v1110_v16  ;;  %v2005_v44 = vpop.f32.mrb[9].mxu0  ;;  %v2111_v22 = vpop.f32.mrb[9].mxu1  ;;  %v5074_v14 = vld [vmem:[#allocation70_spill] sm:$0xff] }
 0x297   :  { %v4805_v51 = vadd.f32 %v2005_v44, %v1109_v13  ;;  %v4807_v52 = vadd.f32 %v2111_v22, %v1111_v18  ;;  %v2007_v25 = vpop.f32.mrb[10].mxu0  ;;  %v2113_v53 = vpop.f32.mrb[10].mxu1  ;;  %v1123_v9 = vadd.f32 %v4719_v42, %v5074_v14  ;;  %v4103_v14 = vld [vmem:[#allocation3 + $0x360] ss:$16 sps:$4 sm:$0xff]  }
 0x298   :  { %v2128_v54 = vpack.c.bf16 %v2007_v25, %v2003_v20  ;;  %v4809_v26 = vadd.f32 %v2007_v25, %v1112_v31  ;;  %v4811_v55 = vpack.c.bf16 %v2113_v53, %v2109_v12  ;;  %v4813_v56 = vadd.f32 %v2113_v53, %v1114_v39  ;;  %v2009_v57 = vpop.f32.mrb[11].mxu0  ;;  %v2115_v58 = vpop.f32.mrb[11].mxu1  ;;  %v4058_v25 = vld [vmem:[#allocation3 + $0x268] ss:$16 sps:$4 sm:$0xff]   ;;  %v4063_v53 = vld [vmem:[#allocation3 + $0x284] ss:$16 sps:$4 sm:$0xff]  }
 0x299   :  { %v2129_v59 = vpack.c.bf16 %v2009_v57, %v2005_v44  ;;  %v4815_v29 = vadd.f32 %v2009_v57, %v1113_v23  ;;  %v4817_v60 = vpack.c.bf16 %v2115_v58, %v2111_v22  ;;  %v4819_v30 = vadd.f32 %v2115_v58, %v1115_v24  ;;  %v4049_v22 = vld [vmem:[#allocation3 + $0x240] ss:$16 sps:$4 sm:$0xff]   ;;  %v4057_v23 = vld [vmem:[#allocation3 + $0x264] ss:$16 sps:$4 sm:$0xff]   ;;  %v4064_v58 = vld [vmem:[#allocation3 + $0x288] ss:$16 sps:$4 sm:$0xff]  }
 0x29a   :  { %v4055_v24 = vld [vmem:[#allocation3 + $0x260] ss:$16 sps:$4 sm:$0xff]  }
 0x29b   :  { %3000 = vmatprep.mubr.bf16.mxu0 %v2129_v59  ;;  %3106 = vmatprep.mubr.bf16.mxu1 %v2129_v59  ;;  %v4061_v57 = vld [vmem:[#allocation3 + $0x280] ss:$16 sps:$4 sm:$0xff]   ;;  %v4069_v59 = vld [vmem:[#allocation3 + $0x2a4] ss:$16 sps:$4 sm:$0xff]  }
 0x29c   :  { %3001 = vmatmul.mubr.bf16.vlgmr.msra.gmra.mrb[16].mxu0 %v2128_v54  ;;  %3107 = vmatmul.mubr.bf16.vlgmr.msra.gmra.mrb[16].mxu1 %v2128_v54  ;;  %v4066_v54 = vld [vmem:[#allocation3 + $0x28c] ss:$16 sps:$4 sm:$0xff]  }
 0x29d   :  { %3022 = vmatpush1.bf16.msra.mxu0 %v4037_v61  ;;  %3128 = vmatpush1.bf16.msra.mxu1 %v4040_v62  ;;  %v2013_v28 = vpop.f32.mrb[12].mxu0  ;;  %v2119_v48 = vpop.f32.mrb[12].mxu1  ;;  %v4072_v61 = vld [vmem:[#allocation3 + $0x2ac] ss:$16 sps:$4 sm:$0xff]   ;;  %v4067_v62 = vld [vmem:[#allocation3 + $0x2a0] ss:$16 sps:$4 sm:$0xff]  }
 0x29e   :  { %v4830_v19 = vadd.f32 %v2013_v28, %v1116_v2  ;;  %v4832_v34 = vadd.f32 %v2119_v48, %v1118_v50  ;;  %v2015_v47 = vpop.f32.mrb[13].mxu0  ;;  %v2121_v35 = vpop.f32.mrb[13].mxu1  ;;  %3023 = vmatprep.subr.bf16.mxu0 %v4045_v63  ;;  %3129 = vmatprep.subr.bf16.mxu1 %v4048_v0  ;;  %v4070_v63 = vld [vmem:[#allocation3 + $0x2a8] ss:$16 sps:$4 sm:$0xff]   ;;  %v4075_v0 = vld [vmem:[#allocation3 + $0x2c4] ss:$16 sps:$4 sm:$0xff]  }
 0x29f   :  { %v4837_v16 = vadd.f32 %v2015_v47, %v1117_v3  ;;  %v4839_v41 = vadd.f32 %v2121_v35, %v1119_v10  ;;  %v2017_v38 = vpop.f32.mrb[14].mxu0  ;;  %v2123_v13 = vpop.f32.mrb[14].mxu1  ;;  %v4076_v2 = vld [vmem:[#allocation3 + $0x2c8] ss:$16 sps:$4 sm:$0xff]   ;;  %v4081_v50 = vld [vmem:[#allocation3 + $0x2e4] ss:$16 sps:$4 sm:$0xff]  }
 0x2a0   :  { %v2132_v4 = vpack.c.bf16 %v2017_v38, %v2013_v28  ;;  %v4841_v18 = vadd.f32 %v2017_v38, %v1120_v7  ;;  %v4843_v20 = vpack.c.bf16 %v2123_v13, %v2119_v48  ;;  %v4845_v12 = vadd.f32 %v2123_v13, %v1122_v46  ;;  %v2019_v27 = vpop.f32.mrb[15].mxu0  ;;  %v2125_v31 = vpop.f32.mrb[15].mxu1  ;;  %v4079_v3 = vld [vmem:[#allocation3 + $0x2e0] ss:$16 sps:$4 sm:$0xff]   ;;  %v4087_v7 = vld [vmem:[#allocation3 + $0x304] ss:$16 sps:$4 sm:$0xff]  }
 0x2a1   :  { %v2133_v40 = vpack.c.bf16 %v2019_v27, %v2015_v47  ;;  %v4847_v39 = vadd.f32 %v2019_v27, %v1121_v36  ;;  %v4849_v42 = vpack.c.bf16 %v2125_v31, %v2121_v35  ;;  %v4851_v44 = vadd.f32 %v2125_v31, %v1123_v9  ;;  %3024 = vmatpush1.bf16.msra.mxu0 %v4043_v11  ;;  %v4085_v10 = vld [vmem:[#allocation3 + $0x300] ss:$16 sps:$4 sm:$0xff]   ;;  %v4088_v28 = vld [vmem:[#allocation3 + $0x308] ss:$16 sps:$4 sm:$0xff]   ;;  %v4093_v48 = vld [vmem:[#allocation3 + $0x324] ss:$16 sps:$4 sm:$0xff]  }
 0x2a2   :  { %3130 = vmatpush1.bf16.msra.mxu1 %v4046_v17  ;;  %3025 = vmatprep.subr.bf16.mxu0 %v4051_v37  ;;  %v4096_v11 = vld [vmem:[#allocation3 + $0x32c] ss:$16 sps:$4 sm:$0xff]   ;;  %v4094_v46 = vld [vmem:[#allocation3 + $0x328] ss:$16 sps:$4 sm:$0xff]   ;;  %v4099_v47 = vld [vmem:[#allocation3 + $0x344] ss:$16 sps:$4 sm:$0xff]  }
 0x2a3   :  { %3010 = vmatprep.mubr.bf16.mxu0 %v2133_v40  ;;  %3116 = vmatprep.mubr.bf16.mxu1 %v2133_v40  ;;  %v4102_v35 = vld [vmem:[#allocation3 + $0x34c] ss:$16 sps:$4 sm:$0xff]   ;;  %v4097_v17 = vld [vmem:[#allocation3 + $0x340] ss:$16 sps:$4 sm:$0xff]   ;;  %v4100_v37 = vld [vmem:[#allocation3 + $0x348] ss:$16 sps:$4 sm:$0xff]  }
 0x2a4   :  { %3131 = vmatprep.subr.bf16.mxu1 %v4054_v32  ;;  %3011 = vmatmul.mubr.bf16.gmra.mrb[20].mxu0 %v2132_v4  ;;  %v4108_v36 = vld [vmem:[#allocation3 + $0x36c] ss:$16 sps:$4 sm:$0xff]   ;;  %v4106_v9 = vld [vmem:[#allocation3 + $0x368] ss:$16 sps:$4 sm:$0xff]   ;;  %v4111_v38 = vld [vmem:[#allocation3 + $0x384] ss:$16 sps:$4 sm:$0xff]  }
 0x2a5   :  { %3026 = vmatpush1.bf16.msra.mxu0 %v4049_v22  ;;  %3117 = vmatmul.mubr.bf16.gmra.mrb[20].mxu1 %v2132_v4  ;;  %v4114_v13 = vld [vmem:[#allocation3 + $0x38c] ss:$16 sps:$4 sm:$0xff]   ;;  %v4109_v4 = vld [vmem:[#allocation3 + $0x380] ss:$16 sps:$4 sm:$0xff]   ;;  %v4112_v27 = vld [vmem:[#allocation3 + $0x388] ss:$16 sps:$4 sm:$0xff]  }
 0x2a6   :  { %3132 = vmatpush1.bf16.msra.mxu1 %v4052_v45  ;;  %3053 = vmatprep.mubr.bf16.mxu0 %v4817_v60  ;;  %v4117_v31 = vld [vmem:[#allocation3 + $0x3a4] ss:$16 sps:$4 sm:$0xff]   ;;  %v4120_v32 = vld [vmem:[#allocation3 + $0x3ac] ss:$16 sps:$4 sm:$0xff]   ;;  %v4115_v40 = vld [vmem:[#allocation3 + $0x3a0] ss:$16 sps:$4 sm:$0xff]  }
 0x2a7   :  { %3159 = vmatprep.mubr.bf16.mxu1 %v4817_v60  ;;  %3027 = vmatprep.subr.bf16.mxu0 %v4057_v23  ;;  %v4073_v60 = vld [vmem:[#allocation3 + $0x2c0] ss:$16 sps:$4 sm:$0xff]   ;;  %v4118_v22 = vld [vmem:[#allocation3 + $0x3a8] ss:$16 sps:$4 sm:$0xff]   ;;  %v4123_v45 = vld [vmem:[#allocation3 + $0x3c4] ss:$16 sps:$4 sm:$0xff]  }
 0x2a8   :  { %3133 = vmatprep.subr.bf16.mxu1 %v4060_v49  ;;  %v4126_v23 = vld [vmem:[#allocation3 + $0x3cc] ss:$16 sps:$4 sm:$0xff]   ;;  %v4121_v49 = vld [vmem:[#allocation3 + $0x3c0] ss:$16 sps:$4 sm:$0xff]  }
 0x2a9   :  { %3028 = vmatpush1.bf16.msra.mxu0 %v4055_v24  ;;  %v4124_v24 = vld [vmem:[#allocation3 + $0x3c8] ss:$16 sps:$4 sm:$0xff]  }
 0x2aa   :  { %3134 = vmatpush1.bf16.msra.mxu1 %v4058_v25  ;;  %3029 = vmatprep.subr.bf16.mxu0 %v4063_v53  ;;  %v4129_v25 = vld [vmem:[#allocation3 + $0x3e4] ss:$16 sps:$4 sm:$0xff]   ;;  %v4132_v53 = vld [vmem:[#allocation3 + $0x3ec] ss:$16 sps:$4 sm:$0xff]  }
 0x2ab   :  { %3135 = vmatprep.subr.bf16.mxu1 %v4066_v54  ;;  %v4127_v54 = vld [vmem:[#allocation3 + $0x3e0] ss:$16 sps:$4 sm:$0xff]  }
 0x2ad   :  { %3030 = vmatpush1.bf16.msra.mxu0 %v4061_v57  ;;  %v4130_v57 = vld [vmem:[#allocation3 + $0x3e8] ss:$16 sps:$4 sm:$0xff]  }
 0x2ae   :  { %3136 = vmatpush1.bf16.msra.mxu1 %v4064_v58  ;;  %3031 = vmatprep.subr.bf16.mxu0 %v4069_v59 }
 0x2af   :  { %3137 = vmatprep.subr.bf16.mxu1 %v4072_v61 }
 0x2b1   :  { %3032 = vmatpush1.bf16.msra.mxu0 %v4067_v62 }
 0x2b2   :  { %3138 = vmatpush1.bf16.msra.mxu1 %v4070_v63  ;;  %3033 = vmatprep.subr.bf16.mxu0 %v4075_v0 }
 0x2b3   :  { %3139 = vmatprep.subr.bf16.mxu1 %v4078_v1 }
 0x2b5   :  { %3034 = vmatpush1.bf16.msra.mxu0 %v4073_v60 }
 0x2b6   :  { %3140 = vmatpush1.bf16.msra.mxu1 %v4076_v2  ;;  %3035 = vmatprep.subr.bf16.mxu0 %v4081_v50 }
 0x2b7   :  { %3141 = vmatprep.subr.bf16.mxu1 %v4084_v15 }
 0x2b9   :  { %3036 = vmatpush1.bf16.msra.mxu0 %v4079_v3 }
 0x2ba   :  { %3142 = vmatpush1.bf16.msra.mxu1 %v4082_v6  ;;  %3037 = vmatprep.subr.bf16.mxu0 %v4087_v7 }
 0x2bb   :  { %3143 = vmatprep.subr.bf16.mxu1 %v4090_v8 }
 0x2bd   :  { %3038 = vmatpush1.bf16.msra.mxu0 %v4085_v10 }
 0x2be   :  { %3144 = vmatpush1.bf16.msra.mxu1 %v4088_v28  ;;  %3039 = vmatprep.subr.bf16.mxu0 %v4093_v48 }
 0x2bf   :  { %3145 = vmatprep.subr.bf16.mxu1 %v4096_v11 }
 0x2c1   :  { %3040 = vmatpush1.bf16.msra.mxu0 %v4091_v33 }
 0x2c2   :  { %3146 = vmatpush1.bf16.msra.mxu1 %v4094_v46  ;;  %3041 = vmatprep.subr.bf16.mxu0 %v4099_v47 }
 0x2c3   :  { %3147 = vmatprep.subr.bf16.mxu1 %v4102_v35 }
 0x2c5   :  { %3042 = vmatpush1.bf16.msra.mxu0 %v4097_v17 }
 0x2c6   :  { %3148 = vmatpush1.bf16.msra.mxu1 %v4100_v37  ;;  %3043 = vmatprep.subr.bf16.mxu0 %v4105_v5 }
 0x2c7   :  { %3149 = vmatprep.subr.bf16.mxu1 %v4108_v36 }
 0x2c9   :  { %3044 = vmatpush1.bf16.msra.mxu0 %v4103_v14 }
 0x2ca   :  { %3150 = vmatpush1.bf16.msra.mxu1 %v4106_v9  ;;  %3045 = vmatprep.subr.bf16.mxu0 %v4111_v38 }
 0x2cb   :  { %3151 = vmatprep.subr.bf16.mxu1 %v4114_v13 }
 0x2cd   :  { %3046 = vmatpush1.bf16.msra.mxu0 %v4109_v4 }
 0x2ce   :  { %3152 = vmatpush1.bf16.msra.mxu1 %v4112_v27  ;;  %3047 = vmatprep.subr.bf16.mxu0 %v4117_v31 }
 0x2cf   :  { %3153 = vmatprep.subr.bf16.mxu1 %v4120_v32 }
 0x2d1   :  { %3048 = vmatpush1.bf16.msra.mxu0 %v4115_v40 }
 0x2d2   :  { %3154 = vmatpush1.bf16.msra.mxu1 %v4118_v22  ;;  %3049 = vmatprep.subr.bf16.mxu0 %v4123_v45 }
 0x2d3   :  { %3155 = vmatprep.subr.bf16.mxu1 %v4126_v23 }
 0x2d5   :  { %3050 = vmatpush1.bf16.msra.mxu0 %v4121_v49 }
 0x2d6   :  { %3156 = vmatpush1.bf16.msra.mxu1 %v4124_v24  ;;  %3051 = vmatprep.subr.bf16.mxu0 %v4129_v25 }
 0x2d7   :  { %3157 = vmatprep.subr.bf16.mxu1 %v4132_v53 }
 0x2d9   :  { %3052 = vmatpush1.bf16.msra.mxu0 %v4127_v54 }
 0x2da   :  { %3158 = vmatpush1.bf16.msra.mxu1 %v4130_v57 }
 0x2dc   :  { %3054 = vmatmul.mubr.bf16.vlgmr.msra.gmra.mrb[16].mxu0 %v4811_v55 }
 0x2dd   :  { %3160 = vmatmul.mubr.bf16.vlgmr.msra.gmra.mrb[16].mxu1 %v4811_v55  ;;  %3063 = vmatprep.mubr.bf16.mxu0 %v4849_v42 }
 0x2de   :  { %3169 = vmatprep.mubr.bf16.mxu1 %v4849_v42 }
 0x2e4   :  { %3064 = vmatmul.mubr.bf16.gmra.mrb[20].mxu0 %v4843_v20 }
 0x2e5   :  { %3170 = vmatmul.mubr.bf16.gmra.mrb[20].mxu1 %v4843_v20 }
 0x3af   :  { %v3055_v58 = vpop.f32.mrb[16].mxu0 }
 0x3b0   :  { %v3212_v59 = vadd.f32 %v3055_v58, %v4799_v43  ;;  %v3161_v61 = vpop.f32.mrb[16].mxu1  ;;  %v3057_v62 = vpop.f32.mrb[17].mxu0 }
 0x3b1   :  { %v3214_v63 = vadd.f32 %v3161_v61, %v4801_v21  ;;  %v3213_v0 = vadd.f32 %v3057_v62, %v4805_v51  ;;  %v3163_v1 = vpop.f32.mrb[17].mxu1  ;;  %v3059_v60 = vpop.f32.mrb[18].mxu0 }
 0x3b2   :  { %v3260_v55 = vmul.f32 0.25, %v3212_v59  ;;  %v3215_v2 = vadd.f32 %v3163_v1, %v4807_v52  ;;  %v3216_v42 = vadd.f32 %v3059_v60, %v4809_v26  ;;  %v3165_v50 = vpop.f32.mrb[18].mxu1  ;;  %v3061_v15 = vpop.f32.mrb[19].mxu0 }
 0x3b3   :  { %v3262_v3 = vmul.f32 0.25, %v3214_v63  ;;  %v3261_v20 = vmul.f32 0.25, %v3213_v0  ;;  %v3218_v6 = vadd.f32 %v3165_v50, %v4813_v56  ;;  %v3217_v43 = vadd.f32 %v3061_v15, %v4815_v29  ;;  %v3167_v7 = vpop.f32.mrb[19].mxu1 }
 0x3b4   :  { %3276 = vst [vmem:[#allocation8] sm:$0xff] %v3260_v55  ;;  %v3263_v21 = vmul.f32 0.25, %v3215_v2  ;;  %v3264_v8 = vmul.f32 0.25, %v3216_v42  ;;  %v3219_v51 = vadd.f32 %v3167_v7, %v4819_v30 }
 0x3b5   :  { %3278 = vst [vmem:[#allocation8 + $0x10] sm:$0xff] %v3262_v3  ;;  %3277 = vst [vmem:[#allocation8 + $0x8] sm:$0xff] %v3261_v20  ;;  %v3266_v10 = vmul.f32 0.25, %v3218_v6  ;;  %v3265_v52 = vmul.f32 0.25, %v3217_v43 }
 0x3b6   :  { %3279 = vst [vmem:[#allocation8 + $0x18] sm:$0xff] %v3263_v21  ;;  %3280 = vst [vmem:[#allocation8 + $0x20] sm:$0xff] %v3264_v8  ;;  %v3267_v26 = vmul.f32 0.25, %v3219_v51 }
 0x3b7   :  { %3282 = vst [vmem:[#allocation8 + $0x30] sm:$0xff] %v3266_v10  ;;  %3281 = vst [vmem:[#allocation8 + $0x28] sm:$0xff] %v3265_v52  ;;  %v3065_v28 = vpop.f32.mrb[20].mxu0 }
 0x3b8   :  { %3283 = vst [vmem:[#allocation8 + $0x38] sm:$0xff] %v3267_v26  ;;  %v3220_v56 = vadd.f32 %v3065_v28, %v4830_v19  ;;  %v3171_v29 = vpop.f32.mrb[20].mxu1  ;;  %v3067_v48 = vpop.f32.mrb[21].mxu0 }
 0x3b9   :  { %v3222_v11 = vadd.f32 %v3171_v29, %v4832_v34  ;;  %v3221_v33 = vadd.f32 %v3067_v48, %v4837_v16  ;;  %v3173_v30 = vpop.f32.mrb[21].mxu1  ;;  %v3069_v46 = vpop.f32.mrb[22].mxu0 }
 0x3ba   :  { %v3268_v47 = vmul.f32 0.25, %v3220_v56  ;;  %v3223_v35 = vadd.f32 %v3173_v30, %v4839_v41  ;;  %v3224_v17 = vadd.f32 %v3069_v46, %v4841_v18  ;;  %v3175_v37 = vpop.f32.mrb[22].mxu1  ;;  %v3071_v5 = vpop.f32.mrb[23].mxu0 }
 0x3bb   :  { %v3270_v36 = vmul.f32 0.25, %v3222_v11  ;;  %v3269_v14 = vmul.f32 0.25, %v3221_v33  ;;  %v3226_v9 = vadd.f32 %v3175_v37, %v4845_v12  ;;  %v3225_v19 = vadd.f32 %v3071_v5, %v4847_v39  ;;  %v3177_v38 = vpop.f32.mrb[23].mxu1 }
 0x3bc   :  { %3284 = vst [vmem:[#allocation8 + $0x40] sm:$0xff] %v3268_v47  ;;  %v3271_v34 = vmul.f32 0.25, %v3223_v35  ;;  %v3272_v16 = vmul.f32 0.25, %v3224_v17  ;;  %v3227_v13 = vadd.f32 %v3177_v38, %v4851_v44 }
 0x3bd   :  { %3286 = vst [vmem:[#allocation8 + $0x50] sm:$0xff] %v3270_v36  ;;  %3285 = vst [vmem:[#allocation8 + $0x48] sm:$0xff] %v3269_v14  ;;  %v3274_v41 = vmul.f32 0.25, %v3226_v9  ;;  %v3273_v18 = vmul.f32 0.25, %v3225_v19 }
 0x3be   :  { %3287 = vst [vmem:[#allocation8 + $0x58] sm:$0xff] %v3271_v34  ;;  %3288 = vst [vmem:[#allocation8 + $0x60] sm:$0xff] %v3272_v16  ;;  %v3275_v4 = vmul.f32 0.25, %v3227_v13 }
 0x3bf   :  { %3290 = vst [vmem:[#allocation8 + $0x70] sm:$0xff] %v3274_v41  ;;  %3289 = vst [vmem:[#allocation8 + $0x68] sm:$0xff] %v3273_v18 }
 0x3c0   :  { %3291 = vst [vmem:[#allocation8 + $0x78] sm:$0xff] %v3275_v4 }
 0x3c1   :  { %4219 = shalt.err (!%p4216_p6)
}
 0x3c2   :  { %s4220_s12 = scalar_lea.hbm %s4894_s2, 2048 }
 0x3c3   :  { %p4221_p7 = scmp.ne.s32.totalorder %s4894_s2, %s4220_s12  ;;  %p4224_p8 = scmp.lt.u32.totalorder %s4220_s12, %s4894_s2 }
 0x3c5   :  { %p4226_p9 = pnand %p4224_p8, %p4221_p7 }
 0x3c7   :  { %4229 = shalt.err (!%p4226_p9)
}
 0x3c8   :  { %3303 = dma.vmem_to_hbm [thread:$0]  %s3298_s8, 2048, %s4894_s2, [#allocation5], %s4240_s0, %s4240_s0, %s4241_s5  }
 0x3c9   :  { %4234 = dma.done.wait [#allocation5], 2048  }
 0x3ca   :  { %4235 = vsyncadd [#allocation5], 4294965248 }
 0x3cb   :  { %3307 = vsyncpa [#allocation4], 1 }
 0x3cc   :  { %3308 = vsyncpa [#allocation7], 1 }
 0x3cd   :  { %3309 = vsyncpa [#allocation5], 1 }

</bundles_post_ra>
